<compile_context>
chip_gen: v6e
topology: v6e:2x2x1
jax: 0.10.0
libtpu: 0.0.40
codegen_flags: <defaults>
</compile_context>

<pallas_src>
import functools
import math

import jax
import jax.numpy as jnp
from jax.experimental import pallas as pl
from jax.experimental.pallas import tpu as pltpu

LN_EPS = 1e-5          # PyTorch nn.LayerNorm default
FREQ_DIM = 256         # TimestepEmbed frequency_embedding_size
PATCH_CFG = [(4, 4, 2), (2, 2, 1), (2, 2, 1), (2, 2, 1)]   # (kernel, stride, pad); stride == kernel


def _round_up(n, m):
    return ((n + m - 1) // m) * m


def _default_row_tile():
    """Row-tile baseline per TPU generation.  Looked up at trace time (no
    lru_cache), so AOT-compiling for another generation in the same process
    does not silently reuse a stale tile size."""
    try:
        kind = jax.devices()[0].device_kind.lower()
    except Exception:
        return 256
    if "v5 lite" in kind or "v5e" in kind or "v5lite" in kind:
        return 128
    if "v6" in kind:
        return 512          # 128 MiB VMEM: larger tiles amortize per-step overhead
    return 256              # v7x (64 MiB VMEM) and default


def _pick_row_tile(rows):
    """Return (row_tile, padded_rows).  Rows stay multiples of 16 so bf16
    sublane packing is unmasked; when there is enough work the tile is split so
    the row grid has >=2 "parallel" steps (both v7x TensorCores get work)."""
    base = _default_row_tile()
    rp = _round_up(rows, 16)
    if rp <= base:
        if rp >= 256 and rp % 32 == 0:
            return rp // 2, rp
        return rp, rp
    return base, _round_up(rows, base)


# -----------------------------------------------------------------------------
# Pallas kernels
# -----------------------------------------------------------------------------
def _patch_embed_kernel(x_ref, w_ref, vec_ref, o_ref, *, c_real):
    """Fused patch embed: y = x @ w + bias ; z = LN(y)*g1+b1 ; out = LN(z)*g2+b2.

    vec_ref packs the five per-channel vectors into one (8, Cp) tile:
      row 0 = conv bias, 1 = patch-LN gamma, 2 = patch-LN beta,
      row 3 = stage-final-LN gamma, 4 = stage-final-LN beta.
    x / w are bf16 (MXU-native); all LayerNorm math is f32.  Channels are
    zero-padded to a 128-lane multiple; LN statistics divide by the true
    channel count `c_real` (padded lanes are exactly zero).  The second LN is
    the stage-final norm1..4 — fusing it here is valid only while the mamba
    blocks are identity.
    """
    inv_c = 1.0 / c_real
    y = jnp.dot(x_ref[...], w_ref[...], preferred_element_type=jnp.float32)
    y = y + vec_ref[0:1, :]

    mu = jnp.sum(y, axis=-1, keepdims=True) * inv_c
    var = jnp.maximum(jnp.sum(y * y, axis=-1, keepdims=True) * inv_c - mu * mu, 0.0)
    z = (y - mu) * jax.lax.rsqrt(var + LN_EPS) * vec_ref[1:2, :] + vec_ref[2:3, :]

    mu2 = jnp.sum(z, axis=-1, keepdims=True) * inv_c
    var2 = jnp.maximum(jnp.sum(z * z, axis=-1, keepdims=True) * inv_c - mu2 * mu2, 0.0)
    o = (z - mu2) * jax.lax.rsqrt(var2 + LN_EPS) * vec_ref[3:4, :] + vec_ref[4:5, :]
    o_ref[...] = o.astype(o_ref.dtype)


def _time_mlp_kernel(tf_ref, w1_ref, bvec_ref, w2_ref, o_ref):
    """All stages' timestep MLPs (Linear -> SiLU -> Linear) in one shot.

    Layer-1 weights are concatenated along the output dim ((F, S*Cp)); layer 2
    is block-diagonal ((S*Cp, S*Cp)), so the whole module is two bf16 MXU
    matmuls with f32 accumulation and no per-stage grid.  bvec row 0 = b1,
    row 1 = b2 (padded lanes zero).
    """
    h = jnp.dot(tf_ref[...], w1_ref[...], preferred_element_type=jnp.float32)
    h = h + bvec_ref[0:1, :]
    h = h * (1.0 / (1.0 + jnp.exp(-h)))          # SiLU in f32
    o = jnp.dot(h.astype(jnp.bfloat16), w2_ref[...],
                preferred_element_type=jnp.float32)
    o_ref[...] = o + bvec_ref[1:2, :]


# -----------------------------------------------------------------------------
# Pallas wrappers
# -----------------------------------------------------------------------------
def patch_embed_fused(col, stage_prep, c_real):
    """col: (rows, K) -> bf16 tokens LN2(LN1(col @ W + b)) of shape (rows, c_real)."""
    w_p = stage_prep["w"]         # (Kp, Cp) bf16, prepared once at param setup
    vec = stage_prep["vec"]       # (8, Cp) f32,  prepared once at param setup
    kp, cp = w_p.shape
    rows, k_dim = col.shape
    row_tile, rp = _pick_row_tile(rows)
    col_p = jnp.pad(col.astype(jnp.bfloat16), ((0, rp - rows), (0, kp - k_dim)))

    # TODO(synk): for large embed dims, tile K with an "arbitrary" reduction grid
    # axis + f32 VMEM accumulator so a full-K weight block never exceeds v7x's
    # 64 MiB VMEM; not needed at these K (<=256) / C (<=128) sizes.
    out = pl.pallas_call(
        functools.partial(_patch_embed_kernel, c_real=c_real),
        out_shape=jax.ShapeDtypeStruct((rp, cp), jnp.bfloat16),
        grid=(rp // row_tile,),
        in_specs=[
            pl.BlockSpec((row_tile, kp), lambda i: (i, 0)),
            pl.BlockSpec((kp, cp), lambda i: (0, 0)),
            pl.BlockSpec((8, cp), lambda i: (0, 0)),
        ],
        out_specs=pl.BlockSpec((row_tile, cp), lambda i: (i, 0)),
        compiler_params=pltpu.CompilerParams(
            dimension_semantics=("parallel",),
            vmem_limit_bytes=32 * 1024 * 1024,
        ),
    )(col_p, w_p, vec)
    return out[:rows, :c_real]


def time_mlp_all(t_freq, w1, bvec, w2):
    """t_freq: (B, F) -> (B, S*Cp) with all stages' Linear-SiLU-Linear fused."""
    bsz, f_dim = t_freq.shape
    s_cp = w1.shape[1]
    bp = _round_up(bsz, 16)
    tf = jnp.pad(t_freq, ((0, bp - bsz), (0, 0))).astype(jnp.bfloat16)
    out = pl.pallas_call(
        _time_mlp_kernel,
        out_shape=jax.ShapeDtypeStruct((bp, s_cp), jnp.float32),
        grid=(1,),
        in_specs=[
            pl.BlockSpec((bp, f_dim), lambda i: (0, 0)),
            pl.BlockSpec((f_dim, s_cp), lambda i: (0, 0)),
            pl.BlockSpec((8, s_cp), lambda i: (0, 0)),
            pl.BlockSpec((s_cp, s_cp), lambda i: (0, 0)),
        ],
        out_specs=pl.BlockSpec((bp, s_cp), lambda i: (0, 0)),
        compiler_params=pltpu.CompilerParams(vmem_limit_bytes=32 * 1024 * 1024),
    )(tf, w1, bvec, w2)
    return out[:bsz, :]


# -----------------------------------------------------------------------------
# Plain-JAX glue (space-to-depth, sinusoidal embedding) — fused under jit
# -----------------------------------------------------------------------------
def space_to_depth(x, k, pad):
    """x: (B, H, W, C) channel-last -> (B, Ho*Wo, C*k*k) with PyTorch Conv2d
    (cin, kh, kw) flattening order.  Valid because stride == kernel (patches do
    not overlap): pure pad + reshape/transpose, no data duplication."""
    b, h, w, c = x.shape
    xp = jnp.pad(x, ((0, 0), (pad, pad), (pad, pad), (0, 0)))
    hp, wp = h + 2 * pad, w + 2 * pad
    ho = (hp - k) // k + 1
    wo = (wp - k) // k + 1
    xp = xp[:, :ho * k, :wo * k, :]
    col = xp.reshape(b, ho, k, wo, k, c)
    col = jnp.transpose(col, (0, 1, 3, 5, 2, 4))          # (B, Ho, Wo, C, kh, kw)
    return col.reshape(b, ho * wo, c * k * k), ho, wo


def timestep_embedding(timesteps, dim, max_period=10000.0):
    half = dim // 2
    freqs = jnp.exp(-math.log(max_period) * jnp.arange(half, dtype=jnp.float32) / half)
    args = timesteps[:, None].astype(jnp.float32) * freqs[None]
    emb = jnp.concatenate([jnp.cos(args), jnp.sin(args)], axis=-1)
    if dim % 2:
        emb = jnp.concatenate([emb, jnp.zeros_like(emb[:, :1])], axis=-1)
    return emb


# -----------------------------------------------------------------------------
# Parameters: synthetic init + one-time (diffusion-step-invariant) preparation
# -----------------------------------------------------------------------------
def init_params(key, in_chans, mask_chans, embed_dims):
    """Deterministic synthetic parameters with the same shapes as the module."""
    params = []
    prev = in_chans
    for i, c_dim in enumerate(embed_dims):
        k, _, _ = PATCH_CFG[i]
        key, k0, k1, k2, k3, k4, k5, k6 = jax.random.split(key, 8)
        p = {
            "proj_w": 0.05 * jax.random.normal(k0, (c_dim, prev, k, k), jnp.float32),
            "proj_b": 0.1 * jax.random.normal(k4, (c_dim,), jnp.float32),
            "ln_patch_g": 1.0 + 0.1 * jax.random.normal(k5, (c_dim,), jnp.float32),
            "ln_patch_b": 0.1 * jax.random.normal(k5, (c_dim,), jnp.float32),
            "norm_g": 1.0 + 0.1 * jax.random.normal(k6, (c_dim,), jnp.float32),
            "norm_b": 0.1 * jax.random.normal(k6, (c_dim,), jnp.float32),
            "mlp_w1": 0.05 * jax.random.normal(k2, (FREQ_DIM, c_dim), jnp.float32),
            "mlp_b1": 0.1 * jax.random.normal(k2, (c_dim,), jnp.float32),
            "mlp_w2": 0.05 * jax.random.normal(k3, (c_dim, c_dim), jnp.float32),
            "mlp_b2": 0.1 * jax.random.normal(k3, (c_dim,), jnp.float32),
        }
        if i == 0 and mask_chans > 0:
            p["mask_w"] = 0.05 * jax.random.normal(k1, (c_dim, mask_chans, k, k), jnp.float32)
            p["mask_b"] = 0.1 * jax.random.normal(k1, (c_dim,), jnp.float32)
        params.append(p)
        prev = c_dim
    return params


def prepare_params(params, embed_dims):
    """Hoisted weight prep (runs ONCE, not per diffusion step): conv weight
    flatten / pad / bf16 cast, per-channel vector packing, and the combined
    time-MLP weights (concatenated layer 1, block-diagonal layer 2)."""
    cmax = _round_up(max(embed_dims), 128)
    stages = []
    for p, c in zip(params, embed_dims):
        cp = _round_up(c, 128)
        w_flat = p["proj_w"].reshape(c, -1).T                     # (Cin*k*k, C)
        bias = p["proj_b"]
        if "mask_w" in p:
            w_flat = jnp.concatenate([w_flat, p["mask_w"].reshape(c, -1).T], axis=0)
            bias = bias + p["mask_b"]
        k_dim = w_flat.shape[0]
        kp = _round_up(k_dim, 128)
        w_p = jnp.pad(w_flat, ((0, kp - k_dim), (0, cp - c))).astype(jnp.bfloat16)
        vec = jnp.zeros((8, cp), jnp.float32)
        for r, v in enumerate((bias, p["ln_patch_g"], p["ln_patch_b"],
                               p["norm_g"], p["norm_b"])):
            vec = vec.at[r, :c].set(v)
        stages.append({"w": w_p, "vec": vec})

    s_cp = len(params) * cmax
    w1 = jnp.concatenate(
        [jnp.pad(p["mlp_w1"], ((0, 0), (0, cmax - c))) for p, c in zip(params, embed_dims)],
        axis=1).astype(jnp.bfloat16)                               # (F, S*Cp)
    w2 = jnp.zeros((s_cp, s_cp), jnp.float32)
    for i, (p, c) in enumerate(zip(params, embed_dims)):
        blk = jnp.pad(p["mlp_w2"], ((0, cmax - c), (0, cmax - c)))
        w2 = w2.at[i * cmax:(i + 1) * cmax, i * cmax:(i + 1) * cmax].set(blk)
    w2 = w2.astype(jnp.bfloat16)                                   # block-diagonal (S*Cp, S*Cp)
    b1 = jnp.concatenate([jnp.pad(p["mlp_b1"], (0, cmax - c)) for p, c in zip(params, embed_dims)])
    b2 = jnp.concatenate([jnp.pad(p["mlp_b2"], (0, cmax - c)) for p, c in zip(params, embed_dims)])
    bvec = jnp.zeros((8, s_cp), jnp.float32).at[0].set(b1).at[1].set(b2)
    return {"stages": stages, "tw1": w1, "tbvec": bvec, "tw2": w2}


# -----------------------------------------------------------------------------
# Forward pass (jitted)
# -----------------------------------------------------------------------------
def diffmamba_forward(prep, x, timesteps, cond_img, *, embed_dims, use_mask):
    """Mirrors DiffMambaBackbone.forward(x, timesteps, cond_img).

    Returns (features [NCHW, f32], per-stage t_emb).  The c_i / w_i tensors are
    consumed only by the mamba blocks, which are treated as identity, so they
    are not materialized; t_emb is returned so its kernel stays live under jit.
    """
    b = x.shape[0]
    n_stages = len(embed_dims)
    cmax = prep["tw1"].shape[1] // n_stages

    # timestep embedding + ALL stage MLPs in one pallas_call (hoisted out of loop)
    t_freq = timestep_embedding(timesteps, FREQ_DIM)
    t_emb_all = time_mlp_all(t_freq, prep["tw1"], prep["tbvec"], prep["tw2"])   # (B, S*Cp)

    features, t_embs = [], []
    cur = jnp.transpose(cond_img, (0, 2, 3, 1))        # NCHW -> channel-last once
    x_nhwc = jnp.transpose(x, (0, 2, 3, 1))
    for i, c_dim in enumerate(embed_dims):
        k, stride, pad = PATCH_CFG[i]
        assert stride == k                              # space-to-depth precondition
        col, ho, wo = space_to_depth(cur, k, pad)
        if i == 0 and use_mask:
            col_m, _, _ = space_to_depth(x_nhwc, k, pad)
            col = jnp.concatenate([col, col_m], axis=-1)   # proj(cond) + mask_proj(x)
        rows = b * ho * wo
        tok = patch_embed_fused(col.reshape(rows, -1), prep["stages"][i], c_dim)  # (rows, C) bf16

        t_embs.append(t_emb_all[:, i * cmax:i * cmax + c_dim])
        # TODO(synk): Spiral/Zig/VMamba/ViM MambaBlock definitions are not part of
        # the reference source; blocks are identity, so c_i / w_i are not built.
        tok = tok.reshape(b, ho, wo, c_dim)             # stays channel-last between stages
        features.append(jnp.transpose(tok, (0, 3, 1, 2)).astype(jnp.float32))
        cur = tok
    return features, t_embs


# -----------------------------------------------------------------------------
# Pure-JAX reference (lax.conv + LayerNorm) with matching bf16 operand casts
# -----------------------------------------------------------------------------
def _ref_conv(x, w, stride, pad):
    return jax.lax.conv_general_dilated(
        x.astype(jnp.bfloat16), w.astype(jnp.bfloat16),
        window_strides=(stride, stride), padding=[(pad, pad), (pad, pad)],
        dimension_numbers=("NCHW", "OIHW", "NCHW"),
        preferred_element_type=jnp.float32)


def _ref_ln(x, g, b):
    mu = jnp.mean(x, axis=-1, keepdims=True)
    var = jnp.mean(jnp.square(x - mu), axis=-1, keepdims=True)
    return (x - mu) * jax.lax.rsqrt(var + LN_EPS) * g + b


def reference_forward(params, x, timesteps, cond_img, *, embed_dims):
    b = x.shape[0]
    t_freq = timestep_embedding(timesteps, FREQ_DIM).astype(jnp.bfloat16)
    feats, t_embs = [], []
    cur = cond_img
    for i, (p, c) in enumerate(zip(params, embed_dims)):
        k, stride, pad = PATCH_CFG[i]
        y = _ref_conv(cur, p["proj_w"], stride, pad) + p["proj_b"][None, :, None, None]
        if i == 0 and "mask_w" in p:
            y = y + _ref_conv(x, p["mask_w"], stride, pad) + p["mask_b"][None, :, None, None]
        ho, wo = y.shape[2], y.shape[3]
        tok = jnp.transpose(y.reshape(b, c, ho * wo), (0, 2, 1))
        tok = _ref_ln(tok, p["ln_patch_g"], p["ln_patch_b"])
        tok = _ref_ln(tok, p["norm_g"], p["norm_b"])
        tok_bf = tok.astype(jnp.bfloat16)
        feats.append(jnp.transpose(tok_bf.astype(jnp.float32).reshape(b, ho, wo, c),
                                   (0, 3, 1, 2)))
        h = jnp.dot(t_freq, p["mlp_w1"].astype(jnp.bfloat16),
                    preferred_element_type=jnp.float32) + p["mlp_b1"]
        h = h * (1.0 / (1.0 + jnp.exp(-h)))
        te = jnp.dot(h.astype(jnp.bfloat16), p["mlp_w2"].astype(jnp.bfloat16),
                     preferred_element_type=jnp.float32) + p["mlp_b2"]
        t_embs.append(te)
        cur = jnp.transpose(tok_bf.reshape(b, ho, wo, c), (0, 3, 1, 2))
    return feats, t_embs


# -----------------------------------------------------------------------------
# Driver
# -----------------------------------------------------------------------------
if __name__ == "__main__":
    key = jax.random.PRNGKey(0)
    k_param, k_x, k_cond = jax.random.split(key, 3)

    batch, in_chans, mask_chans, img = 2, 3, 3, 16
    embed_dims = [16, 32, 64, 128]

    params = init_params(k_param, in_chans, mask_chans, embed_dims)
    prep = prepare_params(params, embed_dims)       # hoisted weight prep: runs once

    x = jax.random.normal(k_x, (batch, mask_chans, img, img), jnp.float32)
    cond_img = jax.random.normal(k_cond, (batch, in_chans, img, img), jnp.float32)
    timesteps = jnp.array([1.0, 25.0], jnp.float32)

    fwd = jax.jit(functools.partial(diffmamba_forward,
                                    embed_dims=tuple(embed_dims),
                                    use_mask=mask_chans > 0))
    feats, t_embs = jax.block_until_ready(fwd(prep, x, timesteps, cond_img))

    ref = jax.jit(functools.partial(reference_forward, embed_dims=tuple(embed_dims)))
    ref_feats, ref_t = jax.block_until_ready(ref(params, x, timesteps, cond_img))

    assert len(feats) == 4 and len(t_embs) == 4
    for f, rf, t, rt, c in zip(feats, ref_feats, t_embs, ref_t, embed_dims):
        assert f.shape == rf.shape and f.shape[0] == batch and f.shape[1] == c
        assert t.shape == (batch, c)
        assert bool(jnp.all(jnp.isfinite(f))) and bool(jnp.all(jnp.isfinite(t)))
        assert float(jnp.max(jnp.abs(f - rf))) < 1e-1     # bf16 rounding tolerance
        assert float(jnp.mean(jnp.abs(f - rf))) < 1e-2
        assert float(jnp.max(jnp.abs(t - rt))) < 5e-2

    print("KERNEL_OK")
</pallas_src>

<mosaic_0001>
module attributes {stable_mosaic.version = 11 : i64} {
  func.func @_patch_embed_kernel(%arg0: i32, %arg1: memref<64x128xbf16, #tpu.memory_space<vmem>>, %arg2: memref<128x128xbf16, #tpu.memory_space<vmem>>, %arg3: memref<8x128xf32, #tpu.memory_space<vmem>>, %arg4: memref<64x128xbf16, #tpu.memory_space<vmem>>) attributes {dimension_semantics = [#tpu.dimension_semantics<parallel>], iteration_bounds = array<i64: 1>, scalar_prefetch = 0 : i64, scratch_operands = 0 : i64, tpu.core_type = #tpu.core_type<tc>, window_params = [{transform_indices = @transform_0, window_bounds = array<i64: 64, 128>}, {pipeline_mode = #tpu.pipeline_mode<synchronous>, transform_indices = @transform_1, window_bounds = array<i64: 128, 128>}, {pipeline_mode = #tpu.pipeline_mode<synchronous>, transform_indices = @transform_2, window_bounds = array<i64: 8, 128>}, {transform_indices = @transform_3, window_bounds = array<i64: 64, 128>}]} {
    %c0 = arith.constant 0 : index
    %c0_0 = arith.constant 0 : index
    %0 = vector.load %arg1[%c0, %c0_0] : memref<64x128xbf16, #tpu.memory_space<vmem>>, vector<64x128xbf16>
    %c0_1 = arith.constant 0 : index
    %c0_2 = arith.constant 0 : index
    %1 = vector.load %arg2[%c0_1, %c0_2] : memref<128x128xbf16, #tpu.memory_space<vmem>>, vector<128x128xbf16>
    %cst = arith.constant dense<0.000000e+00> : vector<64x128xf32>
    %2 = tpu.matmul %0, %1, %cst {dimension_numbers = #tpu.dot_dimension_numbers<[1], [0], [0], [1], [0, 0, 1, 1], [], []>} : vector<64x128xbf16>, vector<128x128xbf16>, vector<64x128xf32> -> vector<64x128xf32>
    %c0_3 = arith.constant 0 : index
    %c0_4 = arith.constant 0 : index
    %3 = vector.load %arg3[%c0_3, %c0_4] : memref<8x128xf32, #tpu.memory_space<vmem>>, vector<1x128xf32>
    %4 = vector.broadcast %3 : vector<1x128xf32> to vector<64x128xf32>
    %5 = arith.addf %2, %4 : vector<64x128xf32>
    %cst_5 = arith.constant dense<0.000000e+00> : vector<64xf32>
    %6 = vector.multi_reduction <add>, %5, %cst_5 [1] : vector<64x128xf32> to vector<64xf32>
    %7 = vector.shape_cast %6 : vector<64xf32> to vector<64x1xf32>
    %cst_6 = arith.constant 6.250000e-02 : f32
    %8 = vector.broadcast %cst_6 : f32 to vector<64x1xf32>
    %9 = arith.mulf %7, %8 : vector<64x1xf32>
    %10 = arith.mulf %5, %5 : vector<64x128xf32>
    %cst_7 = arith.constant dense<0.000000e+00> : vector<64xf32>
    %11 = vector.multi_reduction <add>, %10, %cst_7 [1] : vector<64x128xf32> to vector<64xf32>
    %12 = vector.shape_cast %11 : vector<64xf32> to vector<64x1xf32>
    %cst_8 = arith.constant 6.250000e-02 : f32
    %13 = vector.broadcast %cst_8 : f32 to vector<64x1xf32>
    %14 = arith.mulf %12, %13 : vector<64x1xf32>
    %15 = arith.mulf %9, %9 : vector<64x1xf32>
    %16 = arith.subf %14, %15 : vector<64x1xf32>
    %cst_9 = arith.constant 0.000000e+00 : f32
    %17 = vector.broadcast %cst_9 : f32 to vector<64x1xf32>
    %18 = arith.maximumf %16, %17 : vector<64x1xf32>
    %19 = vector.broadcast %9 : vector<64x1xf32> to vector<64x128xf32>
    %20 = arith.subf %5, %19 : vector<64x128xf32>
    %cst_10 = arith.constant 9.99999974E-6 : f32
    %21 = vector.broadcast %cst_10 : f32 to vector<64x1xf32>
    %22 = arith.addf %18, %21 : vector<64x1xf32>
    %23 = math.rsqrt %22 : vector<64x1xf32>
    %24 = vector.broadcast %23 : vector<64x1xf32> to vector<64x128xf32>
    %25 = arith.mulf %20, %24 : vector<64x128xf32>
    %c1 = arith.constant 1 : index
    %c0_11 = arith.constant 0 : index
    %26 = vector.load %arg3[%c1, %c0_11] : memref<8x128xf32, #tpu.memory_space<vmem>>, vector<1x128xf32>
    %27 = vector.broadcast %26 : vector<1x128xf32> to vector<64x128xf32>
    %28 = arith.mulf %25, %27 : vector<64x128xf32>
    %c2 = arith.constant 2 : index
    %c0_12 = arith.constant 0 : index
    %29 = vector.load %arg3[%c2, %c0_12] : memref<8x128xf32, #tpu.memory_space<vmem>>, vector<1x128xf32>
    %30 = vector.broadcast %29 : vector<1x128xf32> to vector<64x128xf32>
    %31 = arith.addf %28, %30 : vector<64x128xf32>
    %cst_13 = arith.constant dense<0.000000e+00> : vector<64xf32>
    %32 = vector.multi_reduction <add>, %31, %cst_13 [1] : vector<64x128xf32> to vector<64xf32>
    %33 = vector.shape_cast %32 : vector<64xf32> to vector<64x1xf32>
    %cst_14 = arith.constant 6.250000e-02 : f32
    %34 = vector.broadcast %cst_14 : f32 to vector<64x1xf32>
    %35 = arith.mulf %33, %34 : vector<64x1xf32>
    %36 = arith.mulf %31, %31 : vector<64x128xf32>
    %cst_15 = arith.constant dense<0.000000e+00> : vector<64xf32>
    %37 = vector.multi_reduction <add>, %36, %cst_15 [1] : vector<64x128xf32> to vector<64xf32>
    %38 = vector.shape_cast %37 : vector<64xf32> to vector<64x1xf32>
    %cst_16 = arith.constant 6.250000e-02 : f32
    %39 = vector.broadcast %cst_16 : f32 to vector<64x1xf32>
    %40 = arith.mulf %38, %39 : vector<64x1xf32>
    %41 = arith.mulf %35, %35 : vector<64x1xf32>
    %42 = arith.subf %40, %41 : vector<64x1xf32>
    %cst_17 = arith.constant 0.000000e+00 : f32
    %43 = vector.broadcast %cst_17 : f32 to vector<64x1xf32>
    %44 = arith.maximumf %42, %43 : vector<64x1xf32>
    %45 = vector.broadcast %35 : vector<64x1xf32> to vector<64x128xf32>
    %46 = arith.subf %31, %45 : vector<64x128xf32>
    %cst_18 = arith.constant 9.99999974E-6 : f32
    %47 = vector.broadcast %cst_18 : f32 to vector<64x1xf32>
    %48 = arith.addf %44, %47 : vector<64x1xf32>
    %49 = math.rsqrt %48 : vector<64x1xf32>
    %50 = vector.broadcast %49 : vector<64x1xf32> to vector<64x128xf32>
    %51 = arith.mulf %46, %50 : vector<64x128xf32>
    %c3 = arith.constant 3 : index
    %c0_19 = arith.constant 0 : index
    %52 = vector.load %arg3[%c3, %c0_19] : memref<8x128xf32, #tpu.memory_space<vmem>>, vector<1x128xf32>
    %53 = vector.broadcast %52 : vector<1x128xf32> to vector<64x128xf32>
    %54 = arith.mulf %51, %53 : vector<64x128xf32>
    %c4 = arith.constant 4 : index
    %c0_20 = arith.constant 0 : index
    %55 = vector.load %arg3[%c4, %c0_20] : memref<8x128xf32, #tpu.memory_space<vmem>>, vector<1x128xf32>
    %56 = vector.broadcast %55 : vector<1x128xf32> to vector<64x128xf32>
    %57 = arith.addf %54, %56 : vector<64x128xf32>
    %58 = arith.truncf %57 : vector<64x128xf32> to vector<64x128xbf16>
    %c0_21 = arith.constant 0 : index
    %c0_22 = arith.constant 0 : index
    %59 = vector.load %arg4[%c0_21, %c0_22] : memref<64x128xbf16, #tpu.memory_space<vmem>>, vector<64x128xbf16>
    tpu.vector_store %arg4[%c0_21, %c0_22], %58 {strides = array<i32>} : memref<64x128xbf16, #tpu.memory_space<vmem>>, vector<64x128xbf16>,
    return
  }
  func.func @transform_0(%arg0: i32) -> (i32, i32) {
    %c0_i32 = arith.constant 0 : i32
    %c0_i32_0 = arith.constant 0 : i32
    return %arg0, %c0_i32 : i32, i32
  }
  func.func @transform_1(%arg0: i32) -> (i32, i32) {
    %c0_i32 = arith.constant 0 : i32
    %c0_i32_0 = arith.constant 0 : i32
    %c0_i32_1 = arith.constant 0 : i32
    return %c0_i32, %c0_i32_0 : i32, i32
  }
  func.func @transform_2(%arg0: i32) -> (i32, i32) {
    %c0_i32 = arith.constant 0 : i32
    %c0_i32_0 = arith.constant 0 : i32
    %c0_i32_1 = arith.constant 0 : i32
    return %c0_i32, %c0_i32_0 : i32, i32
  }
  func.func @transform_3(%arg0: i32) -> (i32, i32) {
    %c0_i32 = arith.constant 0 : i32
    %c0_i32_0 = arith.constant 0 : i32
    return %arg0, %c0_i32 : i32, i32
  }
}

module attributes {stable_mosaic.version = 11 : i64} {
  func.func @_patch_embed_kernel(%arg0: i32, %arg1: memref<32x128xbf16, #tpu.memory_space<vmem>>, %arg2: memref<128x128xbf16, #tpu.memory_space<vmem>>, %arg3: memref<8x128xf32, #tpu.memory_space<vmem>>, %arg4: memref<32x128xbf16, #tpu.memory_space<vmem>>) attributes {dimension_semantics = [#tpu.dimension_semantics<parallel>], iteration_bounds = array<i64: 1>, scalar_prefetch = 0 : i64, scratch_operands = 0 : i64, tpu.core_type = #tpu.core_type<tc>, window_params = [{transform_indices = @transform_0, window_bounds = array<i64: 32, 128>}, {pipeline_mode = #tpu.pipeline_mode<synchronous>, transform_indices = @transform_1, window_bounds = array<i64: 128, 128>}, {pipeline_mode = #tpu.pipeline_mode<synchronous>, transform_indices = @transform_2, window_bounds = array<i64: 8, 128>}, {transform_indices = @transform_3, window_bounds = array<i64: 32, 128>}]} {
    %c0 = arith.constant 0 : index
    %c0_0 = arith.constant 0 : index
    %0 = vector.load %arg1[%c0, %c0_0] : memref<32x128xbf16, #tpu.memory_space<vmem>>, vector<32x128xbf16>
    %c0_1 = arith.constant 0 : index
    %c0_2 = arith.constant 0 : index
    %1 = vector.load %arg2[%c0_1, %c0_2] : memref<128x128xbf16, #tpu.memory_space<vmem>>, vector<128x128xbf16>
    %cst = arith.constant dense<0.000000e+00> : vector<32x128xf32>
    %2 = tpu.matmul %0, %1, %cst {dimension_numbers = #tpu.dot_dimension_numbers<[1], [0], [0], [1], [0, 0, 1, 1], [], []>} : vector<32x128xbf16>, vector<128x128xbf16>, vector<32x128xf32> -> vector<32x128xf32>
    %c0_3 = arith.constant 0 : index
    %c0_4 = arith.constant 0 : index
    %3 = vector.load %arg3[%c0_3, %c0_4] : memref<8x128xf32, #tpu.memory_space<vmem>>, vector<1x128xf32>
    %4 = vector.broadcast %3 : vector<1x128xf32> to vector<32x128xf32>
    %5 = arith.addf %2, %4 : vector<32x128xf32>
    %cst_5 = arith.constant dense<0.000000e+00> : vector<32xf32>
    %6 = vector.multi_reduction <add>, %5, %cst_5 [1] : vector<32x128xf32> to vector<32xf32>
    %7 = vector.shape_cast %6 : vector<32xf32> to vector<32x1xf32>
    %cst_6 = arith.constant 3.125000e-02 : f32
    %8 = vector.broadcast %cst_6 : f32 to vector<32x1xf32>
    %9 = arith.mulf %7, %8 : vector<32x1xf32>
    %10 = arith.mulf %5, %5 : vector<32x128xf32>
    %cst_7 = arith.constant dense<0.000000e+00> : vector<32xf32>
    %11 = vector.multi_reduction <add>, %10, %cst_7 [1] : vector<32x128xf32> to vector<32xf32>
    %12 = vector.shape_cast %11 : vector<32xf32> to vector<32x1xf32>
    %cst_8 = arith.constant 3.125000e-02 : f32
    %13 = vector.broadcast %cst_8 : f32 to vector<32x1xf32>
    %14 = arith.mulf %12, %13 : vector<32x1xf32>
    %15 = arith.mulf %9, %9 : vector<32x1xf32>
    %16 = arith.subf %14, %15 : vector<32x1xf32>
    %cst_9 = arith.constant 0.000000e+00 : f32
    %17 = vector.broadcast %cst_9 : f32 to vector<32x1xf32>
    %18 = arith.maximumf %16, %17 : vector<32x1xf32>
    %19 = vector.broadcast %9 : vector<32x1xf32> to vector<32x128xf32>
    %20 = arith.subf %5, %19 : vector<32x128xf32>
    %cst_10 = arith.constant 9.99999974E-6 : f32
    %21 = vector.broadcast %cst_10 : f32 to vector<32x1xf32>
    %22 = arith.addf %18, %21 : vector<32x1xf32>
    %23 = math.rsqrt %22 : vector<32x1xf32>
    %24 = vector.broadcast %23 : vector<32x1xf32> to vector<32x128xf32>
    %25 = arith.mulf %20, %24 : vector<32x128xf32>
    %c1 = arith.constant 1 : index
    %c0_11 = arith.constant 0 : index
    %26 = vector.load %arg3[%c1, %c0_11] : memref<8x128xf32, #tpu.memory_space<vmem>>, vector<1x128xf32>
    %27 = vector.broadcast %26 : vector<1x128xf32> to vector<32x128xf32>
    %28 = arith.mulf %25, %27 : vector<32x128xf32>
    %c2 = arith.constant 2 : index
    %c0_12 = arith.constant 0 : index
    %29 = vector.load %arg3[%c2, %c0_12] : memref<8x128xf32, #tpu.memory_space<vmem>>, vector<1x128xf32>
    %30 = vector.broadcast %29 : vector<1x128xf32> to vector<32x128xf32>
    %31 = arith.addf %28, %30 : vector<32x128xf32>
    %cst_13 = arith.constant dense<0.000000e+00> : vector<32xf32>
    %32 = vector.multi_reduction <add>, %31, %cst_13 [1] : vector<32x128xf32> to vector<32xf32>
    %33 = vector.shape_cast %32 : vector<32xf32> to vector<32x1xf32>
    %cst_14 = arith.constant 3.125000e-02 : f32
    %34 = vector.broadcast %cst_14 : f32 to vector<32x1xf32>
    %35 = arith.mulf %33, %34 : vector<32x1xf32>
    %36 = arith.mulf %31, %31 : vector<32x128xf32>
    %cst_15 = arith.constant dense<0.000000e+00> : vector<32xf32>
    %37 = vector.multi_reduction <add>, %36, %cst_15 [1] : vector<32x128xf32> to vector<32xf32>
    %38 = vector.shape_cast %37 : vector<32xf32> to vector<32x1xf32>
    %cst_16 = arith.constant 3.125000e-02 : f32
    %39 = vector.broadcast %cst_16 : f32 to vector<32x1xf32>
    %40 = arith.mulf %38, %39 : vector<32x1xf32>
    %41 = arith.mulf %35, %35 : vector<32x1xf32>
    %42 = arith.subf %40, %41 : vector<32x1xf32>
    %cst_17 = arith.constant 0.000000e+00 : f32
    %43 = vector.broadcast %cst_17 : f32 to vector<32x1xf32>
    %44 = arith.maximumf %42, %43 : vector<32x1xf32>
    %45 = vector.broadcast %35 : vector<32x1xf32> to vector<32x128xf32>
    %46 = arith.subf %31, %45 : vector<32x128xf32>
    %cst_18 = arith.constant 9.99999974E-6 : f32
    %47 = vector.broadcast %cst_18 : f32 to vector<32x1xf32>
    %48 = arith.addf %44, %47 : vector<32x1xf32>
    %49 = math.rsqrt %48 : vector<32x1xf32>
    %50 = vector.broadcast %49 : vector<32x1xf32> to vector<32x128xf32>
    %51 = arith.mulf %46, %50 : vector<32x128xf32>
    %c3 = arith.constant 3 : index
    %c0_19 = arith.constant 0 : index
    %52 = vector.load %arg3[%c3, %c0_19] : memref<8x128xf32, #tpu.memory_space<vmem>>, vector<1x128xf32>
    %53 = vector.broadcast %52 : vector<1x128xf32> to vector<32x128xf32>
    %54 = arith.mulf %51, %53 : vector<32x128xf32>
    %c4 = arith.constant 4 : index
    %c0_20 = arith.constant 0 : index
    %55 = vector.load %arg3[%c4, %c0_20] : memref<8x128xf32, #tpu.memory_space<vmem>>, vector<1x128xf32>
    %56 = vector.broadcast %55 : vector<1x128xf32> to vector<32x128xf32>
    %57 = arith.addf %54, %56 : vector<32x128xf32>
    %58 = arith.truncf %57 : vector<32x128xf32> to vector<32x128xbf16>
    %c0_21 = arith.constant 0 : index
    %c0_22 = arith.constant 0 : index
    %59 = vector.load %arg4[%c0_21, %c0_22] : memref<32x128xbf16, #tpu.memory_space<vmem>>, vector<32x128xbf16>
    tpu.vector_store %arg4[%c0_21, %c0_22], %58 {strides = array<i32>} : memref<32x128xbf16, #tpu.memory_space<vmem>>, vector<32x128xbf16>,
    return
  }
  func.func @transform_0(%arg0: i32) -> (i32, i32) {
    %c0_i32 = arith.constant 0 : i32
    %c0_i32_0 = arith.constant 0 : i32
    return %arg0, %c0_i32 : i32, i32
  }
  func.func @transform_1(%arg0: i32) -> (i32, i32) {
    %c0_i32 = arith.constant 0 : i32
    %c0_i32_0 = arith.constant 0 : i32
    %c0_i32_1 = arith.constant 0 : i32
    return %c0_i32, %c0_i32_0 : i32, i32
  }
  func.func @transform_2(%arg0: i32) -> (i32, i32) {
    %c0_i32 = arith.constant 0 : i32
    %c0_i32_0 = arith.constant 0 : i32
    %c0_i32_1 = arith.constant 0 : i32
    return %c0_i32, %c0_i32_0 : i32, i32
  }
  func.func @transform_3(%arg0: i32) -> (i32, i32) {
    %c0_i32 = arith.constant 0 : i32
    %c0_i32_0 = arith.constant 0 : i32
    return %arg0, %c0_i32 : i32, i32
  }
}

module attributes {stable_mosaic.version = 11 : i64} {
  func.func @_patch_embed_kernel(%arg0: i32, %arg1: memref<16x128xbf16, #tpu.memory_space<vmem>>, %arg2: memref<128x128xbf16, #tpu.memory_space<vmem>>, %arg3: memref<8x128xf32, #tpu.memory_space<vmem>>, %arg4: memref<16x128xbf16, #tpu.memory_space<vmem>>) attributes {dimension_semantics = [#tpu.dimension_semantics<parallel>], iteration_bounds = array<i64: 1>, scalar_prefetch = 0 : i64, scratch_operands = 0 : i64, tpu.core_type = #tpu.core_type<tc>, window_params = [{transform_indices = @transform_0, window_bounds = array<i64: 16, 128>}, {pipeline_mode = #tpu.pipeline_mode<synchronous>, transform_indices = @transform_1, window_bounds = array<i64: 128, 128>}, {pipeline_mode = #tpu.pipeline_mode<synchronous>, transform_indices = @transform_2, window_bounds = array<i64: 8, 128>}, {transform_indices = @transform_3, window_bounds = array<i64: 16, 128>}]} {
    %c0 = arith.constant 0 : index
    %c0_0 = arith.constant 0 : index
    %0 = vector.load %arg1[%c0, %c0_0] : memref<16x128xbf16, #tpu.memory_space<vmem>>, vector<16x128xbf16>
    %c0_1 = arith.constant 0 : index
    %c0_2 = arith.constant 0 : index
    %1 = vector.load %arg2[%c0_1, %c0_2] : memref<128x128xbf16, #tpu.memory_space<vmem>>, vector<128x128xbf16>
    %cst = arith.constant dense<0.000000e+00> : vector<16x128xf32>
    %2 = tpu.matmul %0, %1, %cst {dimension_numbers = #tpu.dot_dimension_numbers<[1], [0], [0], [1], [0, 0, 1, 1], [], []>} : vector<16x128xbf16>, vector<128x128xbf16>, vector<16x128xf32> -> vector<16x128xf32>
    %c0_3 = arith.constant 0 : index
    %c0_4 = arith.constant 0 : index
    %3 = vector.load %arg3[%c0_3, %c0_4] : memref<8x128xf32, #tpu.memory_space<vmem>>, vector<1x128xf32>
    %4 = vector.broadcast %3 : vector<1x128xf32> to vector<16x128xf32>
    %5 = arith.addf %2, %4 : vector<16x128xf32>
    %cst_5 = arith.constant dense<0.000000e+00> : vector<16xf32>
    %6 = vector.multi_reduction <add>, %5, %cst_5 [1] : vector<16x128xf32> to vector<16xf32>
    %7 = vector.shape_cast %6 : vector<16xf32> to vector<16x1xf32>
    %cst_6 = arith.constant 1.562500e-02 : f32
    %8 = vector.broadcast %cst_6 : f32 to vector<16x1xf32>
    %9 = arith.mulf %7, %8 : vector<16x1xf32>
    %10 = arith.mulf %5, %5 : vector<16x128xf32>
    %cst_7 = arith.constant dense<0.000000e+00> : vector<16xf32>
    %11 = vector.multi_reduction <add>, %10, %cst_7 [1] : vector<16x128xf32> to vector<16xf32>
    %12 = vector.shape_cast %11 : vector<16xf32> to vector<16x1xf32>
    %cst_8 = arith.constant 1.562500e-02 : f32
    %13 = vector.broadcast %cst_8 : f32 to vector<16x1xf32>
    %14 = arith.mulf %12, %13 : vector<16x1xf32>
    %15 = arith.mulf %9, %9 : vector<16x1xf32>
    %16 = arith.subf %14, %15 : vector<16x1xf32>
    %cst_9 = arith.constant 0.000000e+00 : f32
    %17 = vector.broadcast %cst_9 : f32 to vector<16x1xf32>
    %18 = arith.maximumf %16, %17 : vector<16x1xf32>
    %19 = vector.broadcast %9 : vector<16x1xf32> to vector<16x128xf32>
    %20 = arith.subf %5, %19 : vector<16x128xf32>
    %cst_10 = arith.constant 9.99999974E-6 : f32
    %21 = vector.broadcast %cst_10 : f32 to vector<16x1xf32>
    %22 = arith.addf %18, %21 : vector<16x1xf32>
    %23 = math.rsqrt %22 : vector<16x1xf32>
    %24 = vector.broadcast %23 : vector<16x1xf32> to vector<16x128xf32>
    %25 = arith.mulf %20, %24 : vector<16x128xf32>
    %c1 = arith.constant 1 : index
    %c0_11 = arith.constant 0 : index
    %26 = vector.load %arg3[%c1, %c0_11] : memref<8x128xf32, #tpu.memory_space<vmem>>, vector<1x128xf32>
    %27 = vector.broadcast %26 : vector<1x128xf32> to vector<16x128xf32>
    %28 = arith.mulf %25, %27 : vector<16x128xf32>
    %c2 = arith.constant 2 : index
    %c0_12 = arith.constant 0 : index
    %29 = vector.load %arg3[%c2, %c0_12] : memref<8x128xf32, #tpu.memory_space<vmem>>, vector<1x128xf32>
    %30 = vector.broadcast %29 : vector<1x128xf32> to vector<16x128xf32>
    %31 = arith.addf %28, %30 : vector<16x128xf32>
    %cst_13 = arith.constant dense<0.000000e+00> : vector<16xf32>
    %32 = vector.multi_reduction <add>, %31, %cst_13 [1] : vector<16x128xf32> to vector<16xf32>
    %33 = vector.shape_cast %32 : vector<16xf32> to vector<16x1xf32>
    %cst_14 = arith.constant 1.562500e-02 : f32
    %34 = vector.broadcast %cst_14 : f32 to vector<16x1xf32>
    %35 = arith.mulf %33, %34 : vector<16x1xf32>
    %36 = arith.mulf %31, %31 : vector<16x128xf32>
    %cst_15 = arith.constant dense<0.000000e+00> : vector<16xf32>
    %37 = vector.multi_reduction <add>, %36, %cst_15 [1] : vector<16x128xf32> to vector<16xf32>
    %38 = vector.shape_cast %37 : vector<16xf32> to vector<16x1xf32>
    %cst_16 = arith.constant 1.562500e-02 : f32
    %39 = vector.broadcast %cst_16 : f32 to vector<16x1xf32>
    %40 = arith.mulf %38, %39 : vector<16x1xf32>
    %41 = arith.mulf %35, %35 : vector<16x1xf32>
    %42 = arith.subf %40, %41 : vector<16x1xf32>
    %cst_17 = arith.constant 0.000000e+00 : f32
    %43 = vector.broadcast %cst_17 : f32 to vector<16x1xf32>
    %44 = arith.maximumf %42, %43 : vector<16x1xf32>
    %45 = vector.broadcast %35 : vector<16x1xf32> to vector<16x128xf32>
    %46 = arith.subf %31, %45 : vector<16x128xf32>
    %cst_18 = arith.constant 9.99999974E-6 : f32
    %47 = vector.broadcast %cst_18 : f32 to vector<16x1xf32>
    %48 = arith.addf %44, %47 : vector<16x1xf32>
    %49 = math.rsqrt %48 : vector<16x1xf32>
    %50 = vector.broadcast %49 : vector<16x1xf32> to vector<16x128xf32>
    %51 = arith.mulf %46, %50 : vector<16x128xf32>
    %c3 = arith.constant 3 : index
    %c0_19 = arith.constant 0 : index
    %52 = vector.load %arg3[%c3, %c0_19] : memref<8x128xf32, #tpu.memory_space<vmem>>, vector<1x128xf32>
    %53 = vector.broadcast %52 : vector<1x128xf32> to vector<16x128xf32>
    %54 = arith.mulf %51, %53 : vector<16x128xf32>
    %c4 = arith.constant 4 : index
    %c0_20 = arith.constant 0 : index
    %55 = vector.load %arg3[%c4, %c0_20] : memref<8x128xf32, #tpu.memory_space<vmem>>, vector<1x128xf32>
    %56 = vector.broadcast %55 : vector<1x128xf32> to vector<16x128xf32>
    %57 = arith.addf %54, %56 : vector<16x128xf32>
    %58 = arith.truncf %57 : vector<16x128xf32> to vector<16x128xbf16>
    %c0_21 = arith.constant 0 : index
    %c0_22 = arith.constant 0 : index
    %59 = vector.load %arg4[%c0_21, %c0_22] : memref<16x128xbf16, #tpu.memory_space<vmem>>, vector<16x128xbf16>
    tpu.vector_store %arg4[%c0_21, %c0_22], %58 {strides = array<i32>} : memref<16x128xbf16, #tpu.memory_space<vmem>>, vector<16x128xbf16>,
    return
  }
  func.func @transform_0(%arg0: i32) -> (i32, i32) {
    %c0_i32 = arith.constant 0 : i32
    %c0_i32_0 = arith.constant 0 : i32
    return %arg0, %c0_i32 : i32, i32
  }
  func.func @transform_1(%arg0: i32) -> (i32, i32) {
    %c0_i32 = arith.constant 0 : i32
    %c0_i32_0 = arith.constant 0 : i32
    %c0_i32_1 = arith.constant 0 : i32
    return %c0_i32, %c0_i32_0 : i32, i32
  }
  func.func @transform_2(%arg0: i32) -> (i32, i32) {
    %c0_i32 = arith.constant 0 : i32
    %c0_i32_0 = arith.constant 0 : i32
    %c0_i32_1 = arith.constant 0 : i32
    return %c0_i32, %c0_i32_0 : i32, i32
  }
  func.func @transform_3(%arg0: i32) -> (i32, i32) {
    %c0_i32 = arith.constant 0 : i32
    %c0_i32_0 = arith.constant 0 : i32
    return %arg0, %c0_i32 : i32, i32
  }
}

module attributes {stable_mosaic.version = 11 : i64} {
  func.func @_patch_embed_kernel(%arg0: i32, %arg1: memref<16x256xbf16, #tpu.memory_space<vmem>>, %arg2: memref<256x128xbf16, #tpu.memory_space<vmem>>, %arg3: memref<8x128xf32, #tpu.memory_space<vmem>>, %arg4: memref<16x128xbf16, #tpu.memory_space<vmem>>) attributes {dimension_semantics = [#tpu.dimension_semantics<parallel>], iteration_bounds = array<i64: 1>, scalar_prefetch = 0 : i64, scratch_operands = 0 : i64, tpu.core_type = #tpu.core_type<tc>, window_params = [{transform_indices = @transform_0, window_bounds = array<i64: 16, 256>}, {pipeline_mode = #tpu.pipeline_mode<synchronous>, transform_indices = @transform_1, window_bounds = array<i64: 256, 128>}, {pipeline_mode = #tpu.pipeline_mode<synchronous>, transform_indices = @transform_2, window_bounds = array<i64: 8, 128>}, {transform_indices = @transform_3, window_bounds = array<i64: 16, 128>}]} {
    %c0 = arith.constant 0 : index
    %c0_0 = arith.constant 0 : index
    %0 = vector.load %arg1[%c0, %c0_0] : memref<16x256xbf16, #tpu.memory_space<vmem>>, vector<16x256xbf16>
    %c0_1 = arith.constant 0 : index
    %c0_2 = arith.constant 0 : index
    %1 = vector.load %arg2[%c0_1, %c0_2] : memref<256x128xbf16, #tpu.memory_space<vmem>>, vector<256x128xbf16>
    %cst = arith.constant dense<0.000000e+00> : vector<16x128xf32>
    %2 = tpu.matmul %0, %1, %cst {dimension_numbers = #tpu.dot_dimension_numbers<[1], [0], [0], [1], [0, 0, 1, 1], [], []>} : vector<16x256xbf16>, vector<256x128xbf16>, vector<16x128xf32> -> vector<16x128xf32>
    %c0_3 = arith.constant 0 : index
    %c0_4 = arith.constant 0 : index
    %3 = vector.load %arg3[%c0_3, %c0_4] : memref<8x128xf32, #tpu.memory_space<vmem>>, vector<1x128xf32>
    %4 = vector.broadcast %3 : vector<1x128xf32> to vector<16x128xf32>
    %5 = arith.addf %2, %4 : vector<16x128xf32>
    %cst_5 = arith.constant dense<0.000000e+00> : vector<16xf32>
    %6 = vector.multi_reduction <add>, %5, %cst_5 [1] : vector<16x128xf32> to vector<16xf32>
    %7 = vector.shape_cast %6 : vector<16xf32> to vector<16x1xf32>
    %cst_6 = arith.constant 7.812500e-03 : f32
    %8 = vector.broadcast %cst_6 : f32 to vector<16x1xf32>
    %9 = arith.mulf %7, %8 : vector<16x1xf32>
    %10 = arith.mulf %5, %5 : vector<16x128xf32>
    %cst_7 = arith.constant dense<0.000000e+00> : vector<16xf32>
    %11 = vector.multi_reduction <add>, %10, %cst_7 [1] : vector<16x128xf32> to vector<16xf32>
    %12 = vector.shape_cast %11 : vector<16xf32> to vector<16x1xf32>
    %cst_8 = arith.constant 7.812500e-03 : f32
    %13 = vector.broadcast %cst_8 : f32 to vector<16x1xf32>
    %14 = arith.mulf %12, %13 : vector<16x1xf32>
    %15 = arith.mulf %9, %9 : vector<16x1xf32>
    %16 = arith.subf %14, %15 : vector<16x1xf32>
    %cst_9 = arith.constant 0.000000e+00 : f32
    %17 = vector.broadcast %cst_9 : f32 to vector<16x1xf32>
    %18 = arith.maximumf %16, %17 : vector<16x1xf32>
    %19 = vector.broadcast %9 : vector<16x1xf32> to vector<16x128xf32>
    %20 = arith.subf %5, %19 : vector<16x128xf32>
    %cst_10 = arith.constant 9.99999974E-6 : f32
    %21 = vector.broadcast %cst_10 : f32 to vector<16x1xf32>
    %22 = arith.addf %18, %21 : vector<16x1xf32>
    %23 = math.rsqrt %22 : vector<16x1xf32>
    %24 = vector.broadcast %23 : vector<16x1xf32> to vector<16x128xf32>
    %25 = arith.mulf %20, %24 : vector<16x128xf32>
    %c1 = arith.constant 1 : index
    %c0_11 = arith.constant 0 : index
    %26 = vector.load %arg3[%c1, %c0_11] : memref<8x128xf32, #tpu.memory_space<vmem>>, vector<1x128xf32>
    %27 = vector.broadcast %26 : vector<1x128xf32> to vector<16x128xf32>
    %28 = arith.mulf %25, %27 : vector<16x128xf32>
    %c2 = arith.constant 2 : index
    %c0_12 = arith.constant 0 : index
    %29 = vector.load %arg3[%c2, %c0_12] : memref<8x128xf32, #tpu.memory_space<vmem>>, vector<1x128xf32>
    %30 = vector.broadcast %29 : vector<1x128xf32> to vector<16x128xf32>
    %31 = arith.addf %28, %30 : vector<16x128xf32>
    %cst_13 = arith.constant dense<0.000000e+00> : vector<16xf32>
    %32 = vector.multi_reduction <add>, %31, %cst_13 [1] : vector<16x128xf32> to vector<16xf32>
    %33 = vector.shape_cast %32 : vector<16xf32> to vector<16x1xf32>
    %cst_14 = arith.constant 7.812500e-03 : f32
    %34 = vector.broadcast %cst_14 : f32 to vector<16x1xf32>
    %35 = arith.mulf %33, %34 : vector<16x1xf32>
    %36 = arith.mulf %31, %31 : vector<16x128xf32>
    %cst_15 = arith.constant dense<0.000000e+00> : vector<16xf32>
    %37 = vector.multi_reduction <add>, %36, %cst_15 [1] : vector<16x128xf32> to vector<16xf32>
    %38 = vector.shape_cast %37 : vector<16xf32> to vector<16x1xf32>
    %cst_16 = arith.constant 7.812500e-03 : f32
    %39 = vector.broadcast %cst_16 : f32 to vector<16x1xf32>
    %40 = arith.mulf %38, %39 : vector<16x1xf32>
    %41 = arith.mulf %35, %35 : vector<16x1xf32>
    %42 = arith.subf %40, %41 : vector<16x1xf32>
    %cst_17 = arith.constant 0.000000e+00 : f32
    %43 = vector.broadcast %cst_17 : f32 to vector<16x1xf32>
    %44 = arith.maximumf %42, %43 : vector<16x1xf32>
    %45 = vector.broadcast %35 : vector<16x1xf32> to vector<16x128xf32>
    %46 = arith.subf %31, %45 : vector<16x128xf32>
    %cst_18 = arith.constant 9.99999974E-6 : f32
    %47 = vector.broadcast %cst_18 : f32 to vector<16x1xf32>
    %48 = arith.addf %44, %47 : vector<16x1xf32>
    %49 = math.rsqrt %48 : vector<16x1xf32>
    %50 = vector.broadcast %49 : vector<16x1xf32> to vector<16x128xf32>
    %51 = arith.mulf %46, %50 : vector<16x128xf32>
    %c3 = arith.constant 3 : index
    %c0_19 = arith.constant 0 : index
    %52 = vector.load %arg3[%c3, %c0_19] : memref<8x128xf32, #tpu.memory_space<vmem>>, vector<1x128xf32>
    %53 = vector.broadcast %52 : vector<1x128xf32> to vector<16x128xf32>
    %54 = arith.mulf %51, %53 : vector<16x128xf32>
    %c4 = arith.constant 4 : index
    %c0_20 = arith.constant 0 : index
    %55 = vector.load %arg3[%c4, %c0_20] : memref<8x128xf32, #tpu.memory_space<vmem>>, vector<1x128xf32>
    %56 = vector.broadcast %55 : vector<1x128xf32> to vector<16x128xf32>
    %57 = arith.addf %54, %56 : vector<16x128xf32>
    %58 = arith.truncf %57 : vector<16x128xf32> to vector<16x128xbf16>
    %c0_21 = arith.constant 0 : index
    %c0_22 = arith.constant 0 : index
    %59 = vector.load %arg4[%c0_21, %c0_22] : memref<16x128xbf16, #tpu.memory_space<vmem>>, vector<16x128xbf16>
    tpu.vector_store %arg4[%c0_21, %c0_22], %58 {strides = array<i32>} : memref<16x128xbf16, #tpu.memory_space<vmem>>, vector<16x128xbf16>,
    return
  }
  func.func @transform_0(%arg0: i32) -> (i32, i32) {
    %c0_i32 = arith.constant 0 : i32
    %c0_i32_0 = arith.constant 0 : i32
    return %arg0, %c0_i32 : i32, i32
  }
  func.func @transform_1(%arg0: i32) -> (i32, i32) {
    %c0_i32 = arith.constant 0 : i32
    %c0_i32_0 = arith.constant 0 : i32
    %c0_i32_1 = arith.constant 0 : i32
    return %c0_i32, %c0_i32_0 : i32, i32
  }
  func.func @transform_2(%arg0: i32) -> (i32, i32) {
    %c0_i32 = arith.constant 0 : i32
    %c0_i32_0 = arith.constant 0 : i32
    %c0_i32_1 = arith.constant 0 : i32
    return %c0_i32, %c0_i32_0 : i32, i32
  }
  func.func @transform_3(%arg0: i32) -> (i32, i32) {
    %c0_i32 = arith.constant 0 : i32
    %c0_i32_0 = arith.constant 0 : i32
    return %arg0, %c0_i32 : i32, i32
  }
}

module attributes {stable_mosaic.version = 11 : i64} {
  func.func @_time_mlp_kernel(%arg0: i32, %arg1: memref<16x256xbf16, #tpu.memory_space<vmem>>, %arg2: memref<256x512xbf16, #tpu.memory_space<vmem>>, %arg3: memref<8x512xf32, #tpu.memory_space<vmem>>, %arg4: memref<512x512xbf16, #tpu.memory_space<vmem>>, %arg5: memref<16x512xf32, #tpu.memory_space<vmem>>) attributes {dimension_semantics = [#tpu.dimension_semantics<arbitrary>], iteration_bounds = array<i64: 1>, scalar_prefetch = 0 : i64, scratch_operands = 0 : i64, tpu.core_type = #tpu.core_type<tc>, window_params = [{pipeline_mode = #tpu.pipeline_mode<synchronous>, transform_indices = @transform_0, window_bounds = array<i64: 16, 256>}, {pipeline_mode = #tpu.pipeline_mode<synchronous>, transform_indices = @transform_1, window_bounds = array<i64: 256, 512>}, {pipeline_mode = #tpu.pipeline_mode<synchronous>, transform_indices = @transform_2, window_bounds = array<i64: 8, 512>}, {pipeline_mode = #tpu.pipeline_mode<synchronous>, transform_indices = @transform_3, window_bounds = array<i64: 512, 512>}, {pipeline_mode = #tpu.pipeline_mode<synchronous>, transform_indices = @transform_4, window_bounds = array<i64: 16, 512>}]} {
    %c0 = arith.constant 0 : index
    %c0_0 = arith.constant 0 : index
    %0 = vector.load %arg1[%c0, %c0_0] : memref<16x256xbf16, #tpu.memory_space<vmem>>, vector<16x256xbf16>
    %c0_1 = arith.constant 0 : index
    %c0_2 = arith.constant 0 : index
    %1 = vector.load %arg2[%c0_1, %c0_2] : memref<256x512xbf16, #tpu.memory_space<vmem>>, vector<256x512xbf16>
    %cst = arith.constant dense<0.000000e+00> : vector<16x512xf32>
    %2 = tpu.matmul %0, %1, %cst {dimension_numbers = #tpu.dot_dimension_numbers<[1], [0], [0], [1], [0, 0, 1, 1], [], []>} : vector<16x256xbf16>, vector<256x512xbf16>, vector<16x512xf32> -> vector<16x512xf32>
    %c0_3 = arith.constant 0 : index
    %c0_4 = arith.constant 0 : index
    %3 = vector.load %arg3[%c0_3, %c0_4] : memref<8x512xf32, #tpu.memory_space<vmem>>, vector<1x512xf32>
    %4 = vector.broadcast %3 : vector<1x512xf32> to vector<16x512xf32>
    %5 = arith.addf %2, %4 : vector<16x512xf32>
    %cst_5 = arith.constant 0.000000e+00 : f32
    %6 = vector.broadcast %cst_5 : f32 to vector<16x512xf32>
    %7 = arith.subf %6, %5 : vector<16x512xf32>
    %8 = math.exp %7 : vector<16x512xf32>
    %cst_6 = arith.constant 1.000000e+00 : f32
    %9 = vector.broadcast %cst_6 : f32 to vector<16x512xf32>
    %10 = arith.addf %9, %8 : vector<16x512xf32>
    %cst_7 = arith.constant 1.000000e+00 : f32
    %11 = vector.broadcast %cst_7 : f32 to vector<16x512xf32>
    %12 = arith.divf %11, %10 : vector<16x512xf32>
    %13 = arith.mulf %5, %12 : vector<16x512xf32>
    %14 = arith.truncf %13 : vector<16x512xf32> to vector<16x512xbf16>
    %c0_8 = arith.constant 0 : index
    %c0_9 = arith.constant 0 : index
    %15 = vector.load %arg4[%c0_8, %c0_9] : memref<512x512xbf16, #tpu.memory_space<vmem>>, vector<512x512xbf16>
    %cst_10 = arith.constant dense<0.000000e+00> : vector<16x512xf32>
    %16 = tpu.matmul %14, %15, %cst_10 {dimension_numbers = #tpu.dot_dimension_numbers<[1], [0], [0], [1], [0, 0, 1, 1], [], []>} : vector<16x512xbf16>, vector<512x512xbf16>, vector<16x512xf32> -> vector<16x512xf32>
    %c1 = arith.constant 1 : index
    %c0_11 = arith.constant 0 : index
    %17 = vector.load %arg3[%c1, %c0_11] : memref<8x512xf32, #tpu.memory_space<vmem>>, vector<1x512xf32>
    %18 = vector.broadcast %17 : vector<1x512xf32> to vector<16x512xf32>
    %19 = arith.addf %16, %18 : vector<16x512xf32>
    %c0_12 = arith.constant 0 : index
    %c0_13 = arith.constant 0 : index
    %20 = vector.load %arg5[%c0_12, %c0_13] : memref<16x512xf32, #tpu.memory_space<vmem>>, vector<16x512xf32>
    tpu.vector_store %arg5[%c0_12, %c0_13], %19 {strides = array<i32>} : memref<16x512xf32, #tpu.memory_space<vmem>>, vector<16x512xf32>,
    return
  }
  func.func @transform_0(%arg0: i32) -> (i32, i32) {
    %c0_i32 = arith.constant 0 : i32
    %c0_i32_0 = arith.constant 0 : i32
    %c0_i32_1 = arith.constant 0 : i32
    return %c0_i32, %c0_i32_0 : i32, i32
  }
  func.func @transform_1(%arg0: i32) -> (i32, i32) {
    %c0_i32 = arith.constant 0 : i32
    %c0_i32_0 = arith.constant 0 : i32
    %c0_i32_1 = arith.constant 0 : i32
    return %c0_i32, %c0_i32_0 : i32, i32
  }
  func.func @transform_2(%arg0: i32) -> (i32, i32) {
    %c0_i32 = arith.constant 0 : i32
    %c0_i32_0 = arith.constant 0 : i32
    %c0_i32_1 = arith.constant 0 : i32
    return %c0_i32, %c0_i32_0 : i32, i32
  }
  func.func @transform_3(%arg0: i32) -> (i32, i32) {
    %c0_i32 = arith.constant 0 : i32
    %c0_i32_0 = arith.constant 0 : i32
    %c0_i32_1 = arith.constant 0 : i32
    return %c0_i32, %c0_i32_0 : i32, i32
  }
  func.func @transform_4(%arg0: i32) -> (i32, i32) {
    %c0_i32 = arith.constant 0 : i32
    %c0_i32_0 = arith.constant 0 : i32
    %c0_i32_1 = arith.constant 0 : i32
    return %c0_i32, %c0_i32_0 : i32, i32
  }
}

</mosaic_0001>

<bundles_post_ra>
// kernel: diffmamba_forward.6
= control target key start
LH: loop header
LB: loop body
LE: loop exit
PB: predicated region body
PF: predicated region fallthrough
CT: control target
= control target key end

     0   :  { %s907_s1 = inlined_call_operand.vmem [shape: bf16[128,128], index: 1, kind: input, shape index: {}]   ;;  %s908_s0 = inlined_call_operand.vmem [shape: bf16[64,128], index: 0, kind: input, shape index: {}]   ;;  %s909_s2 = inlined_call_operand.vmem [shape: f32[8,128], index: 2, kind: input, shape index: {}]   ;;  %s910_s3 = inlined_call_operand.vmem [shape: bf16[64,128], index: 3, kind: output, shape index: {}]  }
   0x1   :  { %v609_v0 = vld [vmem:[%s907_s1 + $0x38] sm:$0xff]   ;;  %v610_v1 = vld [vmem:[%s907_s1 + $0x30] sm:$0xff]   ;;  %v611_v2 = vld [vmem:[%s907_s1 + $0x28] sm:$0xff]  }
   0x2   :  { %569 = vmatprep.subr.bf16.mxu0 %v609_v0  ;;  %593 = vmatprep.subr.bf16.mxu1 %v609_v0  ;;  %v612_v3 = vld [vmem:[%s907_s1 + $0x20] sm:$0xff]   ;;  %v618_v5 = vld [vmem:[%s908_s0 + $0x10] sm:$0xff]   ;;  %v613_v6 = vld [vmem:[%s907_s1 + $0x18] sm:$0xff]  }
   0x3   :  { %570 = vmatpush3.bf16.msra.mxu0 %v609_v0  ;;  %601 = vmatpush3.bf16.msra.mxu1 %v609_v0  ;;  %v617_v4 = vld [vmem:[%s908_s0] sm:$0xff]   ;;  %v614_v7 = vld [vmem:[%s907_s1 + $0x10] sm:$0xff]   ;;  %v615_v8 = vld [vmem:[%s907_s1 + $0x8] sm:$0xff]  }
   0x4   :  { %571 = vmatprep.subr.bf16.mxu0 %v610_v1  ;;  %594 = vmatprep.subr.bf16.mxu1 %v610_v1  ;;  %v616_v9 = vld [vmem:[%s907_s1] sm:$0xff]   ;;  %v619_v10 = vld [vmem:[%s908_s0 + $0x8] sm:$0xff]   ;;  %v620_v11 = vld [vmem:[%s908_s0 + $0x18] sm:$0xff]  }
   0x5   :  { %585 = vmatprep.mubr.bf16.mxu0 %v617_v4  ;;  %589 = vmatprep.mubr.bf16.mxu1 %v618_v5  ;;  %v501_v12 = vld [vmem:[%s909_s2] ss:$0 sm:$0xff] }
   0x7   :  { %572 = vmatpush3.bf16.msra.mxu0 %v610_v1  ;;  %602 = vmatpush3.bf16.msra.mxu1 %v610_v1 }
   0x8   :  { %573 = vmatprep.subr.bf16.mxu0 %v611_v2  ;;  %595 = vmatprep.subr.bf16.mxu1 %v611_v2 }
   0xb   :  { %574 = vmatpush3.bf16.msra.mxu0 %v611_v2  ;;  %603 = vmatpush3.bf16.msra.mxu1 %v611_v2 }
   0xc   :  { %575 = vmatprep.subr.bf16.mxu0 %v612_v3  ;;  %596 = vmatprep.subr.bf16.mxu1 %v612_v3 }
   0xf   :  { %576 = vmatpush3.bf16.msra.mxu0 %v612_v3  ;;  %604 = vmatpush3.bf16.msra.mxu1 %v612_v3 }
  0x10   :  { %577 = vmatprep.subr.bf16.mxu0 %v613_v6  ;;  %597 = vmatprep.subr.bf16.mxu1 %v613_v6 }
  0x13   :  { %578 = vmatpush3.bf16.msra.mxu0 %v613_v6  ;;  %605 = vmatpush3.bf16.msra.mxu1 %v613_v6 }
  0x14   :  { %579 = vmatprep.subr.bf16.mxu0 %v614_v7  ;;  %598 = vmatprep.subr.bf16.mxu1 %v614_v7 }
  0x17   :  { %580 = vmatpush3.bf16.msra.mxu0 %v614_v7  ;;  %606 = vmatpush3.bf16.msra.mxu1 %v614_v7 }
  0x18   :  { %581 = vmatprep.subr.bf16.mxu0 %v615_v8  ;;  %599 = vmatprep.subr.bf16.mxu1 %v615_v8 }
  0x1b   :  { %582 = vmatpush3.bf16.msra.mxu0 %v615_v8  ;;  %607 = vmatpush3.bf16.msra.mxu1 %v615_v8 }
  0x1c   :  { %583 = vmatprep.subr.bf16.mxu0 %v616_v9  ;;  %600 = vmatprep.subr.bf16.mxu1 %v616_v9 }
  0x1f   :  { %584 = vmatpush3.bf16.msra.mxu0 %v616_v9  ;;  %608 = vmatpush3.bf16.msra.mxu1 %v616_v9 }
  0x22   :  { %586 = vmatmul.mubr.bf16.vlgmr.msra.gmra.mxu0 %v619_v10  ;;  %590 = vmatmul.mubr.bf16.vlgmr.msra.gmra.mxu1 %v620_v11 }
  0xe2   :  { %v587_v13 = vpop.f32.mrf.mxu0  ;;  %v591_v14 = vpop.f32.mrf.mxu1 }
  0xe3   :  { %v712_v15 = vadd.f32 %v587_v13, %v501_v12  ;;  %v714_v16 = vadd.f32 %v591_v14, %v501_v12 }
  0xe4   :  { %v150_v17 = vpop.f32.mrf.mxu0  ;;  %v166_v18 = vpop.f32.mrf.mxu1 }
  0xe5   :  { %193 = vadd.xlane.f32.xlu0 %v714_v16  ;;  %185 = vadd.xlane.f32.xlu1 %v712_v15  ;;  %v718_v20 = vadd.f32 %v501_v12, %v150_v17  ;;  %v724_v23 = vadd.f32 %v501_v12, %v166_v18  ;;  %v207_v27 = vmul.f32 %v712_v15, %v712_v15 }
  0xe6   :  { %v588_v19 = vpop.f32.mrf.mxu0  ;;  %v592_v22 = vpop.f32.mrf.mxu1  ;;  %v211_v36 = vmul.f32 %v714_v16, %v714_v16 }
  0xe7   :  { %v720_v21 = vadd.f32 %v588_v19, %v501_v12  ;;  %v726_v24 = vadd.f32 %v592_v22, %v501_v12  ;;  %v205_v31 = vmul.f32 %v718_v20, %v718_v20  ;;  %v209_v33 = vmul.f32 %v724_v23, %v724_v23 }
  0xe8   :  { %v169_v25 = vpop.f32.mrf.mxu1  ;;  %v153_v28 = vpop.f32.mrf.mxu0 }
  0xe9   :  { %187 = vadd.xlane.f32.xlu1 %v720_v21  ;;  %181 = vadd.xlane.f32.xlu0 %v718_v20  ;;  %v730_v26 = vadd.f32 %v501_v12, %v169_v25  ;;  %v735_v29 = vadd.f32 %v501_v12, %v153_v28  ;;  %v208_v30 = vmul.f32 %v720_v21, %v720_v21 }
  0xea   :  { %v212_v35 = vmul.f32 %v726_v24, %v726_v24 }
  0xeb   :  { %v206_v32 = vmul.f32 %v735_v29, %v735_v29  ;;  %v210_v34 = vmul.f32 %v730_v26, %v730_v26 }
  0xed   :  { %195 = vadd.xlane.f32.xlu1 %v726_v24  ;;  %189 = vadd.xlane.f32.xlu0 %v724_v23 }
  0xf1   :  { %191 = vadd.xlane.f32.xlu1 %v730_v26  ;;  %217 = vadd.xlane.f32.xlu0 %v207_v27 }
  0xf5   :  { %219 = vadd.xlane.f32.xlu1 %v208_v30  ;;  %213 = vadd.xlane.f32.xlu0 %v205_v31 }
  0xf9   :  { %215 = vadd.xlane.f32.xlu1 %v206_v32  ;;  %221 = vadd.xlane.f32.xlu0 %v209_v33 }
  0xfd   :  { %223 = vadd.xlane.f32.xlu1 %v210_v34  ;;  %183 = vadd.xlane.f32.xlu0 %v735_v29 }
 0x101   :  { %227 = vadd.xlane.f32.xlu1 %v212_v35  ;;  %225 = vadd.xlane.f32.xlu0 %v211_v36 }
 0x16e   :  { %v194_v37 = vpop.xlane.xlu0 %193  ;;  %v186_v38 = vpop.xlane.xlu1 %185 }
 0x16f   :  { %v752_v43 = vmul.f32 0.0625, %v186_v38  ;;  %v768_v2 = vmul.f32 0.0625, %v194_v37 }
 0x171   :  { %v239_v46 = vmul.f32 %v752_v43, %v752_v43  ;;  %v243_v17 = vmul.f32 %v768_v2, %v768_v2  ;;  %v263_v38 = vsub.f32 %v712_v15, %v752_v43 }
 0x172   :  { %v188_v39 = vpop.xlane.xlu1 %187  ;;  %v182_v40 = vpop.xlane.xlu0 %181 }
 0x173   :  { %v756_v47 = vmul.f32 0.0625, %v188_v39  ;;  %v760_v55 = vmul.f32 0.0625, %v182_v40 }
 0x175   :  { %v240_v52 = vmul.f32 %v756_v47, %v756_v47  ;;  %v237_v63 = vmul.f32 %v760_v55, %v760_v55  ;;  %v264_v15 = vsub.f32 %v720_v21, %v756_v47 }
 0x176   :  { %v196_v41 = vpop.xlane.xlu1 %195  ;;  %v190_v42 = vpop.xlane.xlu0 %189 }
 0x177   :  { %v766_v0 = vmul.f32 0.0625, %v190_v42  ;;  %v770_v3 = vmul.f32 0.0625, %v196_v41 }
 0x179   :  { %v241_v11 = vmul.f32 %v766_v0, %v766_v0  ;;  %v244_v27 = vmul.f32 %v770_v3, %v770_v3  ;;  %v268_v21 = vsub.f32 %v726_v24, %v770_v3 }
 0x17a   :  { %v192_v44 = vpop.xlane.xlu1 %191  ;;  %v218_v45 = vpop.xlane.xlu0 %217 }
 0x17b   :  { %v231_v48 = vmul.f32 0.0625, %v218_v45  ;;  %v762_v61 = vmul.f32 0.0625, %v192_v44  ;;  %v514_v45 = vld [vmem:[%s909_s2 + $0x1] ss:$0 sm:$0xff] }
 0x17d   :  { %v247_v49 = vsub.f32 %v231_v48, %v239_v46  ;;  %v242_v8 = vmul.f32 %v762_v61, %v762_v61 }
 0x17e   :  { %v220_v50 = vpop.xlane.xlu1 %219  ;;  %v214_v51 = vpop.xlane.xlu0 %213 }
 0x17f   :  { %v255_v53 = vmax.f32 %v247_v49, 0.0  ;;  %v232_v54 = vmul.f32 0.0625, %v220_v50  ;;  %v229_v58 = vmul.f32 0.0625, %v214_v51  ;;  %v515_v51 = vld [vmem:[%s909_s2 + $0x2] ss:$0 sm:$0xff] }
 0x181   :  { %v271_v56 = vadd.f32 1e-05, %v255_v53  ;;  %v248_v57 = vsub.f32 %v232_v54, %v240_v52  ;;  %v245_v4 = vsub.f32 %v229_v58, %v237_v63  ;;  %v261_v63 = vsub.f32 %v718_v20, %v760_v55 }
 0x182   :  { %v216_v59 = vpop.xlane.xlu1 %215  ;;  %v222_v60 = vpop.xlane.xlu0 %221 }
 0x183   :  { %621 = vrsqrt.f32 %v271_v56  ;;  %v256_v62 = vmax.f32 %v248_v57, 0.0  ;;  %v233_v5 = vmul.f32 0.0625, %v222_v60  ;;  %v230_v12 = vmul.f32 0.0625, %v216_v59 }
 0x184   :  { %v253_v18 = vmax.f32 %v245_v4, 0.0 }
 0x185   :  { %v272_v1 = vadd.f32 1e-05, %v256_v62  ;;  %v249_v19 = vsub.f32 %v233_v5, %v241_v11  ;;  %v267_v62 = vsub.f32 %v714_v16, %v768_v2  ;;  %v266_v11 = vsub.f32 %v730_v26, %v762_v61 }
 0x186   :  { %v224_v6 = vpop.xlane.xlu1 %223  ;;  %v184_v7 = vpop.xlane.xlu0 %183  ;;  %v269_v36 = vadd.f32 1e-05, %v253_v18 }
 0x187   :  { %623 = vrsqrt.f32 %v272_v1  ;;  %v234_v9 = vmul.f32 0.0625, %v224_v6  ;;  %v198_v10 = vmul.f32 0.0625, %v184_v7  ;;  %v257_v37 = vmax.f32 %v249_v19, 0.0 }
 0x189   :  { %v250_v13 = vsub.f32 %v234_v9, %v242_v8  ;;  %v238_v14 = vmul.f32 %v198_v10, %v198_v10  ;;  %v273_v50 = vadd.f32 1e-05, %v257_v37  ;;  %v262_v47 = vsub.f32 %v735_v29, %v198_v10 }
 0x18a   :  { %v228_v22 = vpop.xlane.xlu1 %227  ;;  %v226_v25 = vpop.xlane.xlu0 %225  ;;  %v265_v29 = vsub.f32 %v724_v23, %v766_v0 }
 0x18b   :  { %v246_v28 = vsub.f32 %v230_v12, %v238_v14  ;;  %v236_v30 = vmul.f32 0.0625, %v228_v22  ;;  %v235_v31 = vmul.f32 0.0625, %v226_v25  ;;  %v258_v32 = vmax.f32 %v250_v13, 0.0 }
 0x18d   :  { %v254_v33 = vmax.f32 %v246_v28, 0.0  ;;  %v252_v34 = vsub.f32 %v236_v30, %v244_v27  ;;  %v251_v35 = vsub.f32 %v235_v31, %v243_v17  ;;  %v274_v44 = vadd.f32 1e-05, %v258_v32 }
 0x18f   :  { %v270_v39 = vadd.f32 1e-05, %v254_v33  ;;  %v260_v40 = vmax.f32 %v252_v34, 0.0  ;;  %v259_v41 = vmax.f32 %v251_v35, 0.0 }
 0x190   :  { %v622_v42 = vpop.eup %621 }
 0x191   :  { %625 = vrsqrt.f32 %v270_v39  ;;  %v276_v46 = vadd.f32 1e-05, %v260_v40  ;;  %v275_v48 = vadd.f32 1e-05, %v259_v41  ;;  %v287_v49 = vmul.f32 %v622_v42, %v263_v38 }
 0x192   :  { %627 = vrsqrt.f32 %v269_v36 }
 0x193   :  { %629 = vrsqrt.f32 %v276_v46  ;;  %v300_v43 = vmul.f32 %v514_v45, %v287_v49 }
 0x194   :  { %v624_v52 = vpop.eup %623  ;;  %631 = vrsqrt.f32 %v275_v48 }
 0x195   :  { %633 = vrsqrt.f32 %v274_v44  ;;  %v790_v53 = vadd.f32 %v515_v51, %v300_v43  ;;  %v288_v54 = vmul.f32 %v624_v52, %v264_v15 }
 0x196   :  { %635 = vrsqrt.f32 %v273_v50 }
 0x197   :  { %323 = vadd.xlane.f32.xlu0 %v790_v53  ;;  %v301_v56 = vmul.f32 %v514_v45, %v288_v54  ;;  %v345_v18 = vmul.f32 %v790_v53, %v790_v53 }
 0x199   :  { %v793_v57 = vadd.f32 %v515_v51, %v301_v56 }
 0x19b   :  { %325 = vadd.xlane.f32.xlu1 %v793_v57  ;;  %v346_v17 = vmul.f32 %v793_v57, %v793_v57 }
 0x19e   :  { %v626_v58 = vpop.eup %625 }
 0x19f   :  { %v628_v59 = vpop.eup %627  ;;  %v286_v4 = vmul.f32 %v626_v58, %v262_v47 }
 0x1a0   :  { %v630_v60 = vpop.eup %629  ;;  %v285_v8 = vmul.f32 %v628_v59, %v261_v63 }
 0x1a1   :  { %v632_v1 = vpop.eup %631  ;;  %v292_v5 = vmul.f32 %v630_v60, %v268_v21  ;;  %v299_v16 = vmul.f32 %v514_v45, %v286_v4 }
 0x1a2   :  { %v634_v6 = vpop.eup %633  ;;  %v291_v7 = vmul.f32 %v632_v1, %v267_v62  ;;  %v298_v55 = vmul.f32 %v514_v45, %v285_v8 }
 0x1a3   :  { %v636_v9 = vpop.eup %635  ;;  %v305_v24 = vmul.f32 %v514_v45, %v292_v5  ;;  %v290_v2 = vmul.f32 %v634_v6, %v266_v11  ;;  %v813_v13 = vadd.f32 %v515_v51, %v299_v16 }
 0x1a4   :  { %v304_v3 = vmul.f32 %v514_v45, %v291_v7  ;;  %v289_v12 = vmul.f32 %v636_v9, %v265_v29  ;;  %v815_v61 = vadd.f32 %v515_v51, %v298_v55 }
 0x1a5   :  { %v807_v10 = vadd.f32 %v515_v51, %v305_v24  ;;  %v303_v26 = vmul.f32 %v514_v45, %v290_v2  ;;  %v344_v19 = vmul.f32 %v813_v13, %v813_v13 }
 0x1a6   :  { %v809_v20 = vadd.f32 %v515_v51, %v304_v3  ;;  %v302_v14 = vmul.f32 %v514_v45, %v289_v12  ;;  %v343_v22 = vmul.f32 %v815_v61, %v815_v61 }
 0x1a7   :  { %333 = vadd.xlane.f32.xlu1 %v807_v10  ;;  %v819_v23 = vadd.f32 %v515_v51, %v303_v26  ;;  %v350_v28 = vmul.f32 %v807_v10, %v807_v10 }
 0x1a8   :  { %331 = vadd.xlane.f32.xlu0 %v809_v20  ;;  %v821_v0 = vadd.f32 %v515_v51, %v302_v14  ;;  %v349_v30 = vmul.f32 %v809_v20, %v809_v20 }
 0x1a9   :  { %v348_v25 = vmul.f32 %v819_v23, %v819_v23 }
 0x1aa   :  { %v347_v27 = vmul.f32 %v821_v0, %v821_v0 }
 0x1ab   :  { %321 = vadd.xlane.f32.xlu1 %v813_v13 }
 0x1ac   :  { %319 = vadd.xlane.f32.xlu0 %v815_v61 }
 0x1af   :  { %329 = vadd.xlane.f32.xlu1 %v819_v23 }
 0x1b0   :  { %327 = vadd.xlane.f32.xlu0 %v821_v0 }
 0x1b3   :  { %357 = vadd.xlane.f32.xlu1 %v346_v17 }
 0x1b4   :  { %355 = vadd.xlane.f32.xlu0 %v345_v18 }
 0x1b7   :  { %353 = vadd.xlane.f32.xlu1 %v344_v19 }
 0x1b8   :  { %351 = vadd.xlane.f32.xlu0 %v343_v22 }
 0x1bb   :  { %361 = vadd.xlane.f32.xlu1 %v348_v25 }
 0x1bc   :  { %359 = vadd.xlane.f32.xlu0 %v347_v27 }
 0x1bf   :  { %365 = vadd.xlane.f32.xlu1 %v350_v28 }
 0x1c0   :  { %363 = vadd.xlane.f32.xlu0 %v349_v30 }
 0x220   :  { %v324_v32 = vpop.xlane.xlu0 %323 }
 0x221   :  { %v843_v40 = vmul.f32 0.0625, %v324_v32 }
 0x223   :  { %v377_v48 = vmul.f32 %v843_v40, %v843_v40 }
 0x224   :  { %v326_v31 = vpop.xlane.xlu1 %325 }
 0x225   :  { %v841_v38 = vmul.f32 0.0625, %v326_v31 }
 0x227   :  { %v378_v42 = vmul.f32 %v841_v38, %v841_v38 }
 0x230   :  { %v334_v33 = vpop.xlane.xlu1 %333 }
 0x231   :  { %v332_v34 = vpop.xlane.xlu0 %331  ;;  %v861_v4 = vmul.f32 0.0625, %v334_v33 }
 0x232   :  { %v863_v5 = vmul.f32 0.0625, %v332_v34 }
 0x233   :  { %v382_v18 = vmul.f32 %v861_v4, %v861_v4 }
 0x234   :  { %v322_v35 = vpop.xlane.xlu1 %321  ;;  %v381_v27 = vmul.f32 %v863_v5, %v863_v5 }
 0x235   :  { %v320_v36 = vpop.xlane.xlu0 %319  ;;  %v847_v44 = vmul.f32 0.0625, %v322_v35 }
 0x236   :  { %v851_v49 = vmul.f32 0.0625, %v320_v36 }
 0x237   :  { %v376_v52 = vmul.f32 %v847_v44, %v847_v44 }
 0x238   :  { %v330_v37 = vpop.xlane.xlu1 %329  ;;  %v375_v21 = vmul.f32 %v851_v49, %v851_v49 }
 0x239   :  { %v328_v39 = vpop.xlane.xlu0 %327  ;;  %v855_v54 = vmul.f32 0.0625, %v330_v37 }
 0x23a   :  { %v859_v47 = vmul.f32 0.0625, %v328_v39 }
 0x23b   :  { %v380_v9 = vmul.f32 %v855_v54, %v855_v54 }
 0x23c   :  { %v358_v41 = vpop.xlane.xlu1 %357  ;;  %v379_v3 = vmul.f32 %v859_v47, %v859_v47 }
 0x23d   :  { %v370_v45 = vmul.f32 0.0625, %v358_v41  ;;  %v356_v46 = vpop.xlane.xlu0 %355  ;;  %v402_v41 = vsub.f32 %v793_v57, %v841_v38  ;;  %v400_v57 = vsub.f32 %v813_v13, %v847_v44 }
 0x23e   :  { %v369_v50 = vmul.f32 0.0625, %v356_v46  ;;  %v401_v46 = vsub.f32 %v790_v53, %v843_v40 }
 0x23f   :  { %v386_v51 = vsub.f32 %v370_v45, %v378_v42  ;;  %v516_v45 = vld [vmem:[%s909_s2 + $0x3] ss:$0 sm:$0xff] }
 0x240   :  { %v385_v15 = vsub.f32 %v369_v50, %v377_v48  ;;  %v354_v43 = vpop.xlane.xlu1 %353 }
 0x241   :  { %v394_v56 = vmax.f32 %v386_v51, 0.0  ;;  %v368_v58 = vmul.f32 0.0625, %v354_v43  ;;  %v352_v59 = vpop.xlane.xlu0 %351  ;;  %v517_v51 = vld [vmem:[%s909_s2 + $0x4] ss:$0 sm:$0xff] }
 0x242   :  { %v393_v60 = vmax.f32 %v385_v15, 0.0  ;;  %v367_v62 = vmul.f32 0.0625, %v352_v59 }
 0x243   :  { %v410_v63 = vadd.f32 1e-05, %v394_v56  ;;  %v384_v1 = vsub.f32 %v368_v58, %v376_v52  ;;  %v399_v52 = vsub.f32 %v815_v61, %v851_v49 }
 0x244   :  { %v409_v6 = vadd.f32 1e-05, %v393_v60  ;;  %v383_v7 = vsub.f32 %v367_v62, %v375_v21  ;;  %v362_v8 = vpop.xlane.xlu1 %361  ;;  %v404_v60 = vsub.f32 %v819_v23, %v855_v54 }
 0x245   :  { %637 = vrsqrt.f32 %v410_v63  ;;  %v392_v11 = vmax.f32 %v384_v1, 0.0  ;;  %v372_v24 = vmul.f32 0.0625, %v362_v8  ;;  %v360_v29 = vpop.xlane.xlu0 %359  ;;  %v403_v1 = vsub.f32 %v821_v0, %v859_v47 }
 0x246   :  { %639 = vrsqrt.f32 %v409_v6  ;;  %v391_v16 = vmax.f32 %v383_v7, 0.0  ;;  %v371_v2 = vmul.f32 0.0625, %v360_v29 }
 0x247   :  { %v408_v55 = vadd.f32 1e-05, %v392_v11  ;;  %v388_v12 = vsub.f32 %v372_v24, %v380_v9  ;;  %v406_v9 = vsub.f32 %v807_v10, %v861_v4  ;;  %v405_v11 = vsub.f32 %v809_v20, %v863_v5 }
 0x248   :  { %v407_v26 = vadd.f32 1e-05, %v391_v16  ;;  %v387_v14 = vsub.f32 %v371_v2, %v379_v3  ;;  %v366_v17 = vpop.xlane.xlu1 %365 }
 0x249   :  { %641 = vrsqrt.f32 %v408_v55  ;;  %v396_v19 = vmax.f32 %v388_v12, 0.0  ;;  %v374_v22 = vmul.f32 0.0625, %v366_v17  ;;  %v364_v25 = vpop.xlane.xlu0 %363 }
 0x24a   :  { %643 = vrsqrt.f32 %v407_v26  ;;  %v395_v28 = vmax.f32 %v387_v14, 0.0  ;;  %v373_v30 = vmul.f32 0.0625, %v364_v25 }
 0x24b   :  { %v412_v31 = vadd.f32 1e-05, %v396_v19  ;;  %v390_v32 = vsub.f32 %v374_v22, %v382_v18 }
 0x24c   :  { %v411_v33 = vadd.f32 1e-05, %v395_v28  ;;  %v389_v34 = vsub.f32 %v373_v30, %v381_v27 }
 0x24d   :  { %645 = vrsqrt.f32 %v412_v31  ;;  %v398_v35 = vmax.f32 %v390_v32, 0.0 }
 0x24e   :  { %647 = vrsqrt.f32 %v411_v33  ;;  %v397_v36 = vmax.f32 %v389_v34, 0.0 }
 0x24f   :  { %v414_v37 = vadd.f32 1e-05, %v398_v35 }
 0x250   :  { %v413_v39 = vadd.f32 1e-05, %v397_v36 }
 0x251   :  { %649 = vrsqrt.f32 %v414_v37 }
 0x252   :  { %v638_v42 = vpop.eup %637  ;;  %651 = vrsqrt.f32 %v413_v39 }
 0x253   :  { %v640_v48 = vpop.eup %639  ;;  %v426_v50 = vmul.f32 %v638_v42, %v402_v41 }
 0x254   :  { %v425_v15 = vmul.f32 %v640_v48, %v401_v46 }
 0x255   :  { %v439_v38 = vmul.f32 %v516_v45, %v426_v50 }
 0x256   :  { %v642_v43 = vpop.eup %641  ;;  %v438_v56 = vmul.f32 %v516_v45, %v425_v15 }
 0x257   :  { %v644_v58 = vpop.eup %643  ;;  %v452_v59 = vadd.f32 %v517_v51, %v439_v38  ;;  %v424_v53 = vmul.f32 %v642_v43, %v400_v57 }
 0x258   :  { %v451_v40 = vadd.f32 %v517_v51, %v438_v56  ;;  %v423_v21 = vmul.f32 %v644_v58, %v399_v52 }
 0x259   :  { %v437_v62 = vmul.f32 %v516_v45, %v424_v53 }
 0x25a   :  { %v646_v63 = vpop.eup %645  ;;  %v542_v13 = vpack.c.bf16 %v452_v59, %v451_v40  ;;  %v436_v44 = vmul.f32 %v516_v45, %v423_v21 }
 0x25b   :  { %v648_v6 = vpop.eup %647  ;;  %v450_v7 = vadd.f32 %v517_v51, %v437_v62  ;;  %v428_v8 = vmul.f32 %v646_v63, %v404_v60 }
 0x25c   :  { %554 = vst [vmem:[%s910_s3 + $0x8] sm:$0xff] %v542_v13   ;;  %v449_v61 = vadd.f32 %v517_v51, %v436_v44  ;;  %v427_v49 = vmul.f32 %v648_v6, %v403_v1 }
 0x25d   :  { %v441_v23 = vmul.f32 %v516_v45, %v428_v8 }
 0x25e   :  { %v650_v54 = vpop.eup %649  ;;  %v537_v0 = vpack.c.bf16 %v450_v7, %v449_v61  ;;  %v440_v47 = vmul.f32 %v516_v45, %v427_v49 }
 0x25f   :  { %v652_v24 = vpop.eup %651  ;;  %v454_v29 = vadd.f32 %v517_v51, %v441_v23  ;;  %v430_v3 = vmul.f32 %v650_v54, %v406_v9 }
 0x260   :  { %538 = vst [vmem:[%s910_s3] sm:$0xff] %v537_v0   ;;  %v453_v16 = vadd.f32 %v517_v51, %v440_v47  ;;  %v429_v2 = vmul.f32 %v652_v24, %v405_v11 }
 0x261   :  { %v443_v55 = vmul.f32 %v516_v45, %v430_v3 }
 0x262   :  { %v547_v12 = vpack.c.bf16 %v454_v29, %v453_v16  ;;  %v442_v26 = vmul.f32 %v516_v45, %v429_v2 }
 0x263   :  { %v456_v10 = vadd.f32 %v517_v51, %v443_v55 }
 0x264   :  { %555 = vst [vmem:[%s910_s3 + $0x10] sm:$0xff] %v547_v12   ;;  %v455_v20 = vadd.f32 %v517_v51, %v442_v26 }
 0x266   :  { %v552_v4 = vpack.c.bf16 %v456_v10, %v455_v20 }
 0x268   :  { %556 = vst [vmem:[%s910_s3 + $0x18] sm:$0xff] %v552_v4  }

// kernel: diffmamba_forward.7
= control target key start
LH: loop header
LB: loop body
LE: loop exit
PB: predicated region body
PF: predicated region fallthrough
CT: control target
= control target key end

     0   :  { %s506_s1 = inlined_call_operand.vmem [shape: bf16[128,128], index: 1, kind: input, shape index: {}]   ;;  %s507_s0 = inlined_call_operand.vmem [shape: bf16[32,128], index: 0, kind: input, shape index: {}]   ;;  %s508_s2 = inlined_call_operand.vmem [shape: f32[8,128], index: 2, kind: input, shape index: {}]   ;;  %s509_s3 = inlined_call_operand.vmem [shape: bf16[32,128], index: 3, kind: output, shape index: {}]  }
   0x1   :  { %v385_v0 = vld [vmem:[%s506_s1 + $0x38] sm:$0xff]   ;;  %v386_v1 = vld [vmem:[%s506_s1 + $0x30] sm:$0xff]   ;;  %v387_v2 = vld [vmem:[%s506_s1 + $0x28] sm:$0xff]  }
   0x2   :  { %365 = vmatprep.subr.bf16.mxu0 %v385_v0  ;;  %v388_v3 = vld [vmem:[%s506_s1 + $0x20] sm:$0xff]   ;;  %v389_v5 = vld [vmem:[%s506_s1 + $0x18] sm:$0xff]   ;;  %v390_v6 = vld [vmem:[%s506_s1 + $0x10] sm:$0xff]  }
   0x3   :  { %366 = vmatpush3.bf16.msra.mxu0 %v385_v0  ;;  %v393_v4 = vld [vmem:[%s507_s0] sm:$0xff]   ;;  %v391_v7 = vld [vmem:[%s506_s1 + $0x8] sm:$0xff]  }
   0x4   :  { %367 = vmatprep.subr.bf16.mxu0 %v386_v1  ;;  %381 = vmatprep.mubr.bf16.mxu0 %v393_v4  ;;  %v392_v8 = vld [vmem:[%s506_s1] sm:$0xff]   ;;  %v394_v9 = vld [vmem:[%s507_s0 + $0x8] sm:$0xff]  }
   0x5   :  { %v321_v10 = vld [vmem:[%s508_s2] ss:$0 sm:$0xff] }
   0x7   :  { %368 = vmatpush3.bf16.msra.mxu0 %v386_v1  ;;  %v332_v1 = vld [vmem:[%s508_s2 + $0x1] ss:$0 sm:$0xff] }
   0x8   :  { %369 = vmatprep.subr.bf16.mxu0 %v387_v2 }
   0xb   :  { %370 = vmatpush3.bf16.msra.mxu0 %v387_v2 }
   0xc   :  { %371 = vmatprep.subr.bf16.mxu0 %v388_v3 }
   0xf   :  { %372 = vmatpush3.bf16.msra.mxu0 %v388_v3 }
  0x10   :  { %373 = vmatprep.subr.bf16.mxu0 %v389_v5 }
  0x13   :  { %374 = vmatpush3.bf16.msra.mxu0 %v389_v5  ;;  %v333_v5 = vld [vmem:[%s508_s2 + $0x2] ss:$0 sm:$0xff] }
  0x14   :  { %375 = vmatprep.subr.bf16.mxu0 %v390_v6 }
  0x17   :  { %376 = vmatpush3.bf16.msra.mxu0 %v390_v6 }
  0x18   :  { %377 = vmatprep.subr.bf16.mxu0 %v391_v7 }
  0x1b   :  { %378 = vmatpush3.bf16.msra.mxu0 %v391_v7 }
  0x1c   :  { %379 = vmatprep.subr.bf16.mxu0 %v392_v8 }
  0x1f   :  { %380 = vmatpush3.bf16.msra.mxu0 %v392_v8 }
  0x22   :  { %382 = vmatmul.mubr.bf16.vlgmr.msra.gmra.mxu0 %v394_v9 }
  0xe2   :  { %v383_v11 = vpop.f32.mrf.mxu0 }
  0xe3   :  { %v464_v12 = vadd.f32 %v383_v11, %v321_v10 }
  0xe4   :  { %v134_v13 = vpop.f32.mrf.mxu0 }
  0xe5   :  { %v466_v14 = vadd.f32 %v321_v10, %v134_v13  ;;  %153 = vadd.xlane.f32.xlu1 %v464_v12  ;;  %v163_v22 = vmul.f32 %v464_v12, %v464_v12 }
  0xe6   :  { %v384_v15 = vpop.f32.mrf.mxu0 }
  0xe7   :  { %v146_v16 = vadd.f32 %v384_v15, %v321_v10  ;;  %149 = vadd.xlane.f32.xlu0 %v466_v14  ;;  %v161_v19 = vmul.f32 %v466_v14, %v466_v14 }
  0xe8   :  { %v137_v17 = vpop.f32.mrf.mxu0 }
  0xe9   :  { %v138_v18 = vadd.f32 %v321_v10, %v137_v17  ;;  %155 = vadd.xlane.f32.xlu1 %v146_v16  ;;  %v164_v21 = vmul.f32 %v146_v16, %v146_v16 }
  0xeb   :  { %165 = vadd.xlane.f32.xlu0 %v161_v19  ;;  %v162_v20 = vmul.f32 %v138_v18, %v138_v18 }
  0xed   :  { %167 = vadd.xlane.f32.xlu1 %v162_v20 }
  0xef   :  { %151 = vadd.xlane.f32.xlu0 %v138_v18 }
  0xf1   :  { %171 = vadd.xlane.f32.xlu1 %v164_v21 }
  0xf3   :  { %169 = vadd.xlane.f32.xlu0 %v163_v22 }
 0x16e   :  { %v154_v23 = vpop.xlane.xlu1 %153 }
 0x16f   :  { %v159_v34 = vmul.f32 0.03125, %v154_v23 }
 0x170   :  { %v150_v24 = vpop.xlane.xlu0 %149 }
 0x171   :  { %v157_v25 = vmul.f32 0.03125, %v150_v24  ;;  %v179_v43 = vmul.f32 %v159_v34, %v159_v34  ;;  %v191_v60 = vsub.f32 %v464_v12, %v159_v34 }
 0x172   :  { %v156_v26 = vpop.xlane.xlu1 %155 }
 0x173   :  { %v177_v28 = vmul.f32 %v157_v25, %v157_v25  ;;  %v160_v31 = vmul.f32 0.03125, %v156_v26  ;;  %v189_v61 = vsub.f32 %v466_v14, %v157_v25 }
 0x174   :  { %v166_v27 = vpop.xlane.xlu0 %165 }
 0x175   :  { %v173_v29 = vmul.f32 0.03125, %v166_v27  ;;  %v180_v38 = vmul.f32 %v160_v31, %v160_v31  ;;  %v192_v57 = vsub.f32 %v146_v16, %v160_v31 }
 0x176   :  { %v168_v30 = vpop.xlane.xlu1 %167 }
 0x177   :  { %v181_v32 = vsub.f32 %v173_v29, %v177_v28  ;;  %v174_v39 = vmul.f32 0.03125, %v168_v30 }
 0x178   :  { %v152_v33 = vpop.xlane.xlu0 %151 }
 0x179   :  { %v158_v35 = vmul.f32 0.03125, %v152_v33  ;;  %v185_v36 = vmax.f32 %v181_v32, 0.0 }
 0x17a   :  { %v172_v37 = vpop.xlane.xlu1 %171 }
 0x17b   :  { %v178_v40 = vmul.f32 %v158_v35, %v158_v35  ;;  %v176_v41 = vmul.f32 0.03125, %v172_v37  ;;  %v193_v47 = vadd.f32 1e-05, %v185_v36  ;;  %v190_v58 = vsub.f32 %v138_v18, %v158_v35 }
 0x17c   :  { %v170_v42 = vpop.xlane.xlu0 %169 }
 0x17d   :  { %v182_v44 = vsub.f32 %v174_v39, %v178_v40  ;;  %v184_v45 = vsub.f32 %v176_v41, %v180_v38  ;;  %v175_v46 = vmul.f32 0.03125, %v170_v42  ;;  %395 = vrsqrt.f32 %v193_v47 }
 0x17f   :  { %v186_v48 = vmax.f32 %v182_v44, 0.0  ;;  %v188_v49 = vmax.f32 %v184_v45, 0.0  ;;  %v183_v50 = vsub.f32 %v175_v46, %v179_v43 }
 0x181   :  { %v194_v51 = vadd.f32 1e-05, %v186_v48  ;;  %v196_v52 = vadd.f32 1e-05, %v188_v49  ;;  %v187_v53 = vmax.f32 %v183_v50, 0.0 }
 0x183   :  { %397 = vrsqrt.f32 %v194_v51  ;;  %v195_v54 = vadd.f32 1e-05, %v187_v53  ;;  %v334_v51 = vld [vmem:[%s508_s2 + $0x3] ss:$0 sm:$0xff] }
 0x184   :  { %399 = vrsqrt.f32 %v196_v52 }
 0x185   :  { %401 = vrsqrt.f32 %v195_v54 }
 0x18a   :  { %v396_v55 = vpop.eup %395 }
 0x18b   :  { %v201_v3 = vmul.f32 %v396_v55, %v189_v61 }
 0x18d   :  { %v210_v10 = vmul.f32 %v332_v1, %v201_v3 }
 0x18f   :  { %v219_v12 = vadd.f32 %v333_v5, %v210_v10 }
 0x190   :  { %v398_v56 = vpop.eup %397 }
 0x191   :  { %v400_v59 = vpop.eup %399  ;;  %v202_v63 = vmul.f32 %v398_v56, %v190_v58  ;;  %v235_v14 = vmul.f32 %v219_v12, %v219_v12  ;;  %v335_v56 = vld [vmem:[%s508_s2 + $0x4] ss:$0 sm:$0xff] }
 0x192   :  { %v402_v62 = vpop.eup %401  ;;  %v204_v0 = vmul.f32 %v400_v59, %v192_v57 }
 0x193   :  { %v203_v2 = vmul.f32 %v402_v62, %v191_v60  ;;  %v211_v8 = vmul.f32 %v332_v1, %v202_v63 }
 0x194   :  { %v213_v4 = vmul.f32 %v332_v1, %v204_v0 }
 0x195   :  { %v212_v6 = vmul.f32 %v332_v1, %v203_v2  ;;  %v220_v11 = vadd.f32 %v333_v5, %v211_v8 }
 0x196   :  { %v482_v7 = vadd.f32 %v333_v5, %v213_v4 }
 0x197   :  { %v484_v9 = vadd.f32 %v333_v5, %v212_v6  ;;  %v236_v13 = vmul.f32 %v220_v11, %v220_v11 }
 0x198   :  { %229 = vadd.xlane.f32.xlu1 %v482_v7  ;;  %v238_v15 = vmul.f32 %v482_v7, %v482_v7 }
 0x199   :  { %227 = vadd.xlane.f32.xlu0 %v484_v9  ;;  %v237_v16 = vmul.f32 %v484_v9, %v484_v9 }
 0x19c   :  { %225 = vadd.xlane.f32.xlu1 %v220_v11 }
 0x19d   :  { %223 = vadd.xlane.f32.xlu0 %v219_v12 }
 0x1a0   :  { %241 = vadd.xlane.f32.xlu1 %v236_v13 }
 0x1a1   :  { %239 = vadd.xlane.f32.xlu0 %v235_v14 }
 0x1a4   :  { %245 = vadd.xlane.f32.xlu1 %v238_v15 }
 0x1a5   :  { %243 = vadd.xlane.f32.xlu0 %v237_v16 }
 0x221   :  { %v230_v17 = vpop.xlane.xlu1 %229 }
 0x222   :  { %v228_v18 = vpop.xlane.xlu0 %227  ;;  %v234_v24 = vmul.f32 0.03125, %v230_v17 }
 0x223   :  { %v233_v28 = vmul.f32 0.03125, %v228_v18 }
 0x224   :  { %v254_v34 = vmul.f32 %v234_v24, %v234_v24  ;;  %v266_v57 = vsub.f32 %v482_v7, %v234_v24 }
 0x225   :  { %v226_v19 = vpop.xlane.xlu1 %225  ;;  %v253_v38 = vmul.f32 %v233_v28, %v233_v28  ;;  %v265_v60 = vsub.f32 %v484_v9, %v233_v28 }
 0x226   :  { %v232_v20 = vmul.f32 0.03125, %v226_v19  ;;  %v224_v21 = vpop.xlane.xlu0 %223 }
 0x227   :  { %v231_v22 = vmul.f32 0.03125, %v224_v21 }
 0x228   :  { %v252_v25 = vmul.f32 %v232_v20, %v232_v20  ;;  %v264_v49 = vsub.f32 %v220_v11, %v232_v20 }
 0x229   :  { %v242_v23 = vpop.xlane.xlu1 %241  ;;  %v251_v29 = vmul.f32 %v231_v22, %v231_v22  ;;  %v263_v52 = vsub.f32 %v219_v12, %v231_v22 }
 0x22a   :  { %v248_v26 = vmul.f32 0.03125, %v242_v23  ;;  %v240_v27 = vpop.xlane.xlu0 %239 }
 0x22b   :  { %v247_v30 = vmul.f32 0.03125, %v240_v27 }
 0x22c   :  { %v256_v31 = vsub.f32 %v248_v26, %v252_v25 }
 0x22d   :  { %v255_v32 = vsub.f32 %v247_v30, %v251_v29  ;;  %v246_v33 = vpop.xlane.xlu1 %245 }
 0x22e   :  { %v260_v35 = vmax.f32 %v256_v31, 0.0  ;;  %v250_v36 = vmul.f32 0.03125, %v246_v33  ;;  %v244_v37 = vpop.xlane.xlu0 %243 }
 0x22f   :  { %v259_v39 = vmax.f32 %v255_v32, 0.0  ;;  %v249_v40 = vmul.f32 0.03125, %v244_v37 }
 0x230   :  { %v268_v41 = vadd.f32 1e-05, %v260_v35  ;;  %v258_v42 = vsub.f32 %v250_v36, %v254_v34 }
 0x231   :  { %v267_v43 = vadd.f32 1e-05, %v259_v39  ;;  %v257_v44 = vsub.f32 %v249_v40, %v253_v38 }
 0x232   :  { %403 = vrsqrt.f32 %v268_v41  ;;  %v262_v45 = vmax.f32 %v258_v42, 0.0 }
 0x233   :  { %405 = vrsqrt.f32 %v267_v43  ;;  %v261_v46 = vmax.f32 %v257_v44, 0.0 }
 0x234   :  { %v270_v47 = vadd.f32 1e-05, %v262_v45 }
 0x235   :  { %v269_v48 = vadd.f32 1e-05, %v261_v46 }
 0x236   :  { %407 = vrsqrt.f32 %v270_v47 }
 0x237   :  { %409 = vrsqrt.f32 %v269_v48 }
 0x23f   :  { %v404_v50 = vpop.eup %403 }
 0x240   :  { %v406_v53 = vpop.eup %405  ;;  %v276_v54 = vmul.f32 %v404_v50, %v264_v49 }
 0x241   :  { %v275_v55 = vmul.f32 %v406_v53, %v263_v52 }
 0x242   :  { %v285_v58 = vmul.f32 %v334_v51, %v276_v54 }
 0x243   :  { %v408_v59 = vpop.eup %407  ;;  %v284_v61 = vmul.f32 %v334_v51, %v275_v55 }
 0x244   :  { %v410_v62 = vpop.eup %409  ;;  %v278_v63 = vmul.f32 %v408_v59, %v266_v57  ;;  %v294_v0 = vadd.f32 %v335_v56, %v285_v58 }
 0x245   :  { %v293_v1 = vadd.f32 %v335_v56, %v284_v61  ;;  %v277_v2 = vmul.f32 %v410_v62, %v265_v60 }
 0x246   :  { %v287_v3 = vmul.f32 %v334_v51, %v278_v63 }
 0x247   :  { %v347_v4 = vpack.c.bf16 %v294_v0, %v293_v1  ;;  %v286_v5 = vmul.f32 %v334_v51, %v277_v2 }
 0x248   :  { %v296_v6 = vadd.f32 %v335_v56, %v287_v3 }
 0x249   :  { %348 = vst [vmem:[%s509_s3] sm:$0xff] %v347_v4   ;;  %v295_v8 = vadd.f32 %v335_v56, %v286_v5 }
 0x24b   :  { %v352_v7 = vpack.c.bf16 %v296_v6, %v295_v8 }
 0x24d   :  { %354 = vst [vmem:[%s509_s3 + $0x8] sm:$0xff] %v352_v7  }

// kernel: diffmamba_forward.8
= control target key start
LH: loop header
LB: loop body
LE: loop exit
PB: predicated region body
PF: predicated region fallthrough
CT: control target
= control target key end

     0   :  { %v302_v0 = vmov 0.0   ;;  %vm303_vm0 = vmmov 0   ;;  %s369_s1 = inlined_call_operand.vmem [shape: bf16[128,128], index: 1, kind: input, shape index: {}]   ;;  %s370_s0 = inlined_call_operand.vmem [shape: bf16[16,128], index: 0, kind: input, shape index: {}]   ;;  %s371_s2 = inlined_call_operand.vmem [shape: f32[8,128], index: 2, kind: input, shape index: {}]   ;;  %s372_s3 = inlined_call_operand.vmem [shape: bf16[16,128], index: 3, kind: output, shape index: {}]  }
   0x1   :  { %263 = vmatprep.subr.bf16.mxu0 %v302_v0  ;;  %v285_v1 = vld [vmem:[%s369_s1 + $0x38] sm:$0xff]   ;;  %279 = vmatprep.mubr.msk.bf16.mxu0 %vm303_vm0, %v302_v0  ;;  %v286_v2 = vld [vmem:[%s369_s1 + $0x30] sm:$0xff]   ;;  %v287_v3 = vld [vmem:[%s369_s1 + $0x28] sm:$0xff]  }
   0x2   :  { %264 = vmatpush3.bf16.msra.mxu0 %v285_v1  ;;  %v288_v4 = vld [vmem:[%s369_s1 + $0x20] sm:$0xff]   ;;  %v289_v5 = vld [vmem:[%s369_s1 + $0x18] sm:$0xff]   ;;  %v290_v6 = vld [vmem:[%s369_s1 + $0x10] sm:$0xff]  }
   0x3   :  { %265 = vmatprep.subr.bf16.mxu0 %v302_v0  ;;  %v291_v7 = vld [vmem:[%s369_s1 + $0x8] sm:$0xff]   ;;  %v292_v8 = vld [vmem:[%s369_s1] sm:$0xff]  }
   0x4   :  { %v293_v9 = vld [vmem:[%s370_s0] sm:$0xff]  }
   0x5   :  { %v231_v10 = vld [vmem:[%s371_s2] ss:$0 sm:$0xff]  ;;  %v241_v37 = vld [vmem:[%s371_s2 + $0x1] ss:$0 sm:$0xff]  ;;  %v242_v39 = vld [vmem:[%s371_s2 + $0x2] ss:$0 sm:$0xff] }
   0x6   :  { %266 = vmatpush3.bf16.msra.mxu0 %v286_v2 }
   0x7   :  { %267 = vmatprep.subr.bf16.mxu0 %v302_v0 }
   0xa   :  { %268 = vmatpush3.bf16.msra.mxu0 %v287_v3 }
   0xb   :  { %269 = vmatprep.subr.bf16.mxu0 %v302_v0 }
   0xe   :  { %270 = vmatpush3.bf16.msra.mxu0 %v288_v4  ;;  %v243_v4 = vld [vmem:[%s371_s2 + $0x3] ss:$0 sm:$0xff] }
   0xf   :  { %271 = vmatprep.subr.bf16.mxu0 %v302_v0 }
  0x12   :  { %272 = vmatpush3.bf16.msra.mxu0 %v289_v5 }
  0x13   :  { %273 = vmatprep.subr.bf16.mxu0 %v302_v0 }
  0x16   :  { %274 = vmatpush3.bf16.msra.mxu0 %v290_v6 }
  0x17   :  { %275 = vmatprep.subr.bf16.mxu0 %v302_v0 }
  0x1a   :  { %276 = vmatpush3.bf16.msra.mxu0 %v291_v7 }
  0x1b   :  { %277 = vmatprep.subr.bf16.mxu0 %v302_v0 }
  0x1e   :  { %278 = vmatpush3.bf16.msra.mxu0 %v292_v8 }
  0x21   :  { %280 = vmatmul.mubr.bf16.vlgmr.msra.gmra.mxu0 %v293_v9  ;;  %v244_v9 = vld [vmem:[%s371_s2 + $0x4] ss:$0 sm:$0xff] }
  0xe1   :  { %v126_v11 = vpop.f32.mrf.mxu0 }
  0xe2   :  { %v127_v12 = vadd.f32 %v231_v10, %v126_v11 }
  0xe3   :  { %v281_v13 = vpop.f32.mrf.mxu0 }
  0xe4   :  { %133 = vadd.xlane.f32.xlu0 %v127_v12  ;;  %v139_v14 = vmul.f32 %v127_v12, %v127_v12 }
  0xe5   :  { %v129_v15 = vpop.f32.mrf.mxu0 }
  0xe6   :  { %v130_v16 = vadd.f32 %v231_v10, %v129_v15  ;;  %141 = vadd.xlane.f32.xlu1 %v139_v14 }
  0xe7   :  { %v282_v17 = vpop.f32.mrf.mxu0 }
  0xe8   :  { %135 = vadd.xlane.f32.xlu0 %v130_v16  ;;  %v140_v18 = vmul.f32 %v130_v16, %v130_v16 }
  0xea   :  { %143 = vadd.xlane.f32.xlu1 %v140_v18 }
 0x16d   :  { %v134_v19 = vpop.xlane.xlu0 %133 }
 0x16e   :  { %v137_v20 = vmul.f32 0.015625, %v134_v19 }
 0x16f   :  { %v142_v21 = vpop.xlane.xlu1 %141 }
 0x170   :  { %v147_v22 = vmul.f32 %v137_v20, %v137_v20  ;;  %v145_v23 = vmul.f32 0.015625, %v142_v21  ;;  %v153_v35 = vsub.f32 %v127_v12, %v137_v20 }
 0x171   :  { %v136_v24 = vpop.xlane.xlu0 %135 }
 0x172   :  { %v149_v25 = vsub.f32 %v145_v23, %v147_v22  ;;  %v138_v26 = vmul.f32 0.015625, %v136_v24 }
 0x173   :  { %v144_v27 = vpop.xlane.xlu1 %143 }
 0x174   :  { %v151_v28 = vmax.f32 %v149_v25, 0.0  ;;  %v148_v29 = vmul.f32 %v138_v26, %v138_v26  ;;  %v146_v30 = vmul.f32 0.015625, %v144_v27  ;;  %v154_v40 = vsub.f32 %v130_v16, %v138_v26 }
 0x176   :  { %v155_v31 = vadd.f32 1e-05, %v151_v28  ;;  %v150_v32 = vsub.f32 %v146_v30, %v148_v29 }
 0x178   :  { %294 = vrsqrt.f32 %v155_v31  ;;  %v152_v33 = vmax.f32 %v150_v32, 0.0 }
 0x17a   :  { %v156_v34 = vadd.f32 1e-05, %v152_v33 }
 0x17c   :  { %296 = vrsqrt.f32 %v156_v34 }
 0x185   :  { %v295_v36 = vpop.eup %294 }
 0x186   :  { %v159_v38 = vmul.f32 %v295_v36, %v153_v35 }
 0x188   :  { %v166_v41 = vmul.f32 %v241_v37, %v159_v38 }
 0x189   :  { %v297_v42 = vpop.eup %296 }
 0x18a   :  { %v173_v43 = vadd.f32 %v242_v39, %v166_v41  ;;  %v160_v44 = vmul.f32 %v297_v42, %v154_v40 }
 0x18c   :  { %175 = vadd.xlane.f32.xlu0 %v173_v43  ;;  %v167_v45 = vmul.f32 %v241_v37, %v160_v44  ;;  %v181_v46 = vmul.f32 %v173_v43, %v173_v43 }
 0x18e   :  { %v174_v47 = vadd.f32 %v242_v39, %v167_v45 }
 0x190   :  { %183 = vadd.xlane.f32.xlu0 %v181_v46  ;;  %177 = vadd.xlane.f32.xlu1 %v174_v47  ;;  %v182_v48 = vmul.f32 %v174_v47, %v174_v47 }
 0x194   :  { %185 = vadd.xlane.f32.xlu1 %v182_v48 }
 0x215   :  { %v176_v49 = vpop.xlane.xlu0 %175 }
 0x216   :  { %v179_v50 = vmul.f32 0.015625, %v176_v49 }
 0x218   :  { %v189_v53 = vmul.f32 %v179_v50, %v179_v50  ;;  %v195_v1 = vsub.f32 %v173_v43, %v179_v50 }
 0x219   :  { %v184_v51 = vpop.xlane.xlu0 %183  ;;  %v178_v52 = vpop.xlane.xlu1 %177 }
 0x21a   :  { %v187_v54 = vmul.f32 0.015625, %v184_v51  ;;  %v180_v55 = vmul.f32 0.015625, %v178_v52 }
 0x21c   :  { %v191_v56 = vsub.f32 %v187_v54, %v189_v53  ;;  %v190_v59 = vmul.f32 %v180_v55, %v180_v55  ;;  %v196_v5 = vsub.f32 %v174_v47, %v180_v55 }
 0x21d   :  { %v186_v57 = vpop.xlane.xlu1 %185 }
 0x21e   :  { %v193_v58 = vmax.f32 %v191_v56, 0.0  ;;  %v188_v60 = vmul.f32 0.015625, %v186_v57 }
 0x220   :  { %v197_v61 = vadd.f32 1e-05, %v193_v58  ;;  %v192_v62 = vsub.f32 %v188_v60, %v190_v59 }
 0x222   :  { %298 = vrsqrt.f32 %v197_v61  ;;  %v194_v63 = vmax.f32 %v192_v62, 0.0 }
 0x224   :  { %v198_v0 = vadd.f32 1e-05, %v194_v63 }
 0x226   :  { %300 = vrsqrt.f32 %v198_v0 }
 0x22f   :  { %v299_v2 = vpop.eup %298 }
 0x230   :  { %v201_v3 = vmul.f32 %v299_v2, %v195_v1 }
 0x232   :  { %v208_v7 = vmul.f32 %v243_v4, %v201_v3 }
 0x233   :  { %v301_v6 = vpop.eup %300 }
 0x234   :  { %v202_v8 = vmul.f32 %v301_v6, %v196_v5  ;;  %v215_v11 = vadd.f32 %v244_v9, %v208_v7 }
 0x236   :  { %v209_v10 = vmul.f32 %v243_v4, %v202_v8 }
 0x238   :  { %v216_v12 = vadd.f32 %v244_v9, %v209_v10 }
 0x23a   :  { %v252_v13 = vpack.c.bf16 %v216_v12, %v215_v11 }
 0x23c   :  { %253 = vst [vmem:[%s372_s3] sm:$0xff] %v252_v13  }

// kernel: diffmamba_forward.9
= control target key start
LH: loop header
LB: loop body
LE: loop exit
PB: predicated region body
PF: predicated region fallthrough
CT: control target
= control target key end

     0   :  { %s472_s1 = inlined_call_operand.vmem [shape: bf16[256,128], index: 1, kind: input, shape index: {}]   ;;  %s473_s0 = inlined_call_operand.vmem [shape: bf16[16,256], index: 0, kind: input, shape index: {}]   ;;  %s474_s2 = inlined_call_operand.vmem [shape: f32[8,128], index: 2, kind: input, shape index: {}]   ;;  %s475_s3 = inlined_call_operand.vmem [shape: bf16[16,128], index: 3, kind: output, shape index: {}]  }
   0x1   :  { %v353_v0 = vld [vmem:[%s472_s1 + $0x78] sm:$0xff]   ;;  %v355_v2 = vld [vmem:[%s472_s1 + $0x70] sm:$0xff]   ;;  %v357_v4 = vld [vmem:[%s472_s1 + $0x68] sm:$0xff]  }
   0x2   :  { %v354_v1 = vld [vmem:[%s472_s1 + $0x38] sm:$0xff]   ;;  %331 = vmatprep.subr.bf16.mxu0 %v353_v0  ;;  %v356_v3 = vld [vmem:[%s472_s1 + $0x30] sm:$0xff]   ;;  %v358_v5 = vld [vmem:[%s472_s1 + $0x28] sm:$0xff]  }
   0x3   :  { %332 = vmatpush3.bf16.msra.mxu0 %v354_v1  ;;  %v359_v6 = vld [vmem:[%s472_s1 + $0x60] sm:$0xff]   ;;  %v361_v8 = vld [vmem:[%s472_s1 + $0x58] sm:$0xff]   ;;  %v363_v10 = vld [vmem:[%s472_s1 + $0x50] sm:$0xff]  }
   0x4   :  { %333 = vmatprep.subr.bf16.mxu0 %v355_v2  ;;  %v360_v7 = vld [vmem:[%s472_s1 + $0x20] sm:$0xff]   ;;  %v362_v9 = vld [vmem:[%s472_s1 + $0x18] sm:$0xff]   ;;  %v364_v12 = vld [vmem:[%s472_s1 + $0x10] sm:$0xff]  }
   0x5   :  { %v371_v11 = vld [vmem:[%s473_s0 + $0x4] ss:$8 sps:$4 sm:$0xff]   ;;  %v369_v17 = vld [vmem:[%s473_s0] ss:$8 sps:$4 sm:$0xff]  }
   0x6   :  { %192 = vmatprep.mubr.bf16.mxu0 %v371_v11  ;;  %v365_v13 = vld [vmem:[%s472_s1 + $0x48] sm:$0xff]   ;;  %v367_v15 = vld [vmem:[%s472_s1 + $0x40] sm:$0xff]  }
   0x7   :  { %334 = vmatpush3.bf16.msra.mxu0 %v356_v3  ;;  %v366_v14 = vld [vmem:[%s472_s1 + $0x8] sm:$0xff]   ;;  %v368_v16 = vld [vmem:[%s472_s1] sm:$0xff]  }
   0x8   :  { %335 = vmatprep.subr.bf16.mxu0 %v357_v4  ;;  %v299_v19 = vld [vmem:[%s474_s2] ss:$0 sm:$0xff]  ;;  %v318_v47 = vld [vmem:[%s474_s2 + $0x1] ss:$0 sm:$0xff]  ;;  %v319_v49 = vld [vmem:[%s474_s2 + $0x2] ss:$0 sm:$0xff] }
   0xb   :  { %336 = vmatpush3.bf16.msra.mxu0 %v358_v5 }
   0xc   :  { %337 = vmatprep.subr.bf16.mxu0 %v359_v6 }
   0xf   :  { %338 = vmatpush3.bf16.msra.mxu0 %v360_v7 }
  0x10   :  { %339 = vmatprep.subr.bf16.mxu0 %v361_v8 }
  0x13   :  { %340 = vmatpush3.bf16.msra.mxu0 %v362_v9 }
  0x14   :  { %341 = vmatprep.subr.bf16.mxu0 %v363_v10 }
  0x17   :  { %342 = vmatpush3.bf16.msra.mxu0 %v364_v12 }
  0x18   :  { %343 = vmatprep.subr.bf16.mxu0 %v365_v13 }
  0x1b   :  { %344 = vmatpush3.bf16.msra.mxu0 %v366_v14  ;;  %v320_v14 = vld [vmem:[%s474_s2 + $0x3] ss:$0 sm:$0xff] }
  0x1c   :  { %345 = vmatprep.subr.bf16.mxu0 %v367_v15 }
  0x1f   :  { %346 = vmatpush3.bf16.msra.mxu0 %v368_v16 }
  0x22   :  { %193 = vmatmul.mubr.bf16.vlgmr.msra.gmra.mxu0 %v369_v17 }
  0xe2   :  { %v347_v18 = vpop.f32.mrf.mxu0 }
  0xe4   :  { %v348_v20 = vpop.f32.mrf.mxu0 }
  0xe5   :  { %v349_v21 = vadd.f32 %v348_v20, %v347_v18 }
  0xe6   :  { %v350_v22 = vpop.f32.mrf.mxu0 }
  0xe7   :  { %v195_v23 = vadd.f32 %v349_v21, %v299_v19 }
  0xe8   :  { %v351_v24 = vpop.f32.mrf.mxu0 }
  0xe9   :  { %v352_v25 = vadd.f32 %v351_v24, %v350_v22  ;;  %201 = vadd.xlane.f32.xlu0 %v195_v23  ;;  %v207_v26 = vmul.f32 %v195_v23, %v195_v23 }
  0xeb   :  { %v198_v27 = vadd.f32 %v352_v25, %v299_v19  ;;  %209 = vadd.xlane.f32.xlu1 %v207_v26  ;;  %v321_v19 = vld [vmem:[%s474_s2 + $0x4] ss:$0 sm:$0xff] }
  0xed   :  { %203 = vadd.xlane.f32.xlu0 %v198_v27  ;;  %v208_v28 = vmul.f32 %v198_v27, %v198_v27 }
  0xef   :  { %211 = vadd.xlane.f32.xlu1 %v208_v28 }
 0x172   :  { %v202_v29 = vpop.xlane.xlu0 %201 }
 0x173   :  { %v205_v30 = vmul.f32 0.0078125, %v202_v29 }
 0x174   :  { %v210_v31 = vpop.xlane.xlu1 %209 }
 0x175   :  { %v215_v32 = vmul.f32 %v205_v30, %v205_v30  ;;  %v213_v33 = vmul.f32 0.0078125, %v210_v31  ;;  %v221_v45 = vsub.f32 %v195_v23, %v205_v30 }
 0x176   :  { %v204_v34 = vpop.xlane.xlu0 %203 }
 0x177   :  { %v217_v35 = vsub.f32 %v213_v33, %v215_v32  ;;  %v206_v36 = vmul.f32 0.0078125, %v204_v34 }
 0x178   :  { %v212_v37 = vpop.xlane.xlu1 %211 }
 0x179   :  { %v219_v38 = vmax.f32 %v217_v35, 0.0  ;;  %v216_v39 = vmul.f32 %v206_v36, %v206_v36  ;;  %v214_v40 = vmul.f32 0.0078125, %v212_v37  ;;  %v222_v50 = vsub.f32 %v198_v27, %v206_v36 }
 0x17b   :  { %v223_v41 = vadd.f32 1e-05, %v219_v38  ;;  %v218_v42 = vsub.f32 %v214_v40, %v216_v39 }
 0x17d   :  { %372 = vrsqrt.f32 %v223_v41  ;;  %v220_v43 = vmax.f32 %v218_v42, 0.0 }
 0x17f   :  { %v224_v44 = vadd.f32 1e-05, %v220_v43 }
 0x181   :  { %374 = vrsqrt.f32 %v224_v44 }
 0x18a   :  { %v373_v46 = vpop.eup %372 }
 0x18b   :  { %v227_v48 = vmul.f32 %v373_v46, %v221_v45 }
 0x18d   :  { %v234_v51 = vmul.f32 %v318_v47, %v227_v48 }
 0x18e   :  { %v375_v52 = vpop.eup %374 }
 0x18f   :  { %v241_v53 = vadd.f32 %v319_v49, %v234_v51  ;;  %v228_v54 = vmul.f32 %v375_v52, %v222_v50 }
 0x191   :  { %243 = vadd.xlane.f32.xlu0 %v241_v53  ;;  %v235_v55 = vmul.f32 %v318_v47, %v228_v54  ;;  %v249_v56 = vmul.f32 %v241_v53, %v241_v53 }
 0x193   :  { %v242_v57 = vadd.f32 %v319_v49, %v235_v55 }
 0x195   :  { %251 = vadd.xlane.f32.xlu0 %v249_v56  ;;  %245 = vadd.xlane.f32.xlu1 %v242_v57  ;;  %v250_v58 = vmul.f32 %v242_v57, %v242_v57 }
 0x199   :  { %253 = vadd.xlane.f32.xlu1 %v250_v58 }
 0x21a   :  { %v244_v59 = vpop.xlane.xlu0 %243 }
 0x21b   :  { %v247_v60 = vmul.f32 0.0078125, %v244_v59 }
 0x21d   :  { %v257_v63 = vmul.f32 %v247_v60, %v247_v60  ;;  %v263_v11 = vsub.f32 %v241_v53, %v247_v60 }
 0x21e   :  { %v252_v61 = vpop.xlane.xlu0 %251  ;;  %v246_v62 = vpop.xlane.xlu1 %245 }
 0x21f   :  { %v255_v0 = vmul.f32 0.0078125, %v252_v61  ;;  %v248_v1 = vmul.f32 0.0078125, %v246_v62 }
 0x221   :  { %v259_v2 = vsub.f32 %v255_v0, %v257_v63  ;;  %v258_v5 = vmul.f32 %v248_v1, %v248_v1  ;;  %v264_v15 = vsub.f32 %v242_v57, %v248_v1 }
 0x222   :  { %v254_v3 = vpop.xlane.xlu1 %253 }
 0x223   :  { %v261_v4 = vmax.f32 %v259_v2, 0.0  ;;  %v256_v6 = vmul.f32 0.0078125, %v254_v3 }
 0x225   :  { %v265_v7 = vadd.f32 1e-05, %v261_v4  ;;  %v260_v8 = vsub.f32 %v256_v6, %v258_v5 }
 0x227   :  { %376 = vrsqrt.f32 %v265_v7  ;;  %v262_v9 = vmax.f32 %v260_v8, 0.0 }
 0x229   :  { %v266_v10 = vadd.f32 1e-05, %v262_v9 }
 0x22b   :  { %378 = vrsqrt.f32 %v266_v10 }
 0x234   :  { %v377_v12 = vpop.eup %376 }
 0x235   :  { %v269_v13 = vmul.f32 %v377_v12, %v263_v11 }
 0x237   :  { %v276_v17 = vmul.f32 %v320_v14, %v269_v13 }
 0x238   :  { %v379_v16 = vpop.eup %378 }
 0x239   :  { %v270_v18 = vmul.f32 %v379_v16, %v264_v15  ;;  %v283_v21 = vadd.f32 %v321_v19, %v276_v17 }
 0x23b   :  { %v277_v20 = vmul.f32 %v320_v14, %v270_v18 }
 0x23d   :  { %v284_v22 = vadd.f32 %v321_v19, %v277_v20 }
 0x23f   :  { %v329_v23 = vpack.c.bf16 %v284_v22, %v283_v21 }
 0x241   :  { %330 = vst [vmem:[%s475_s3] sm:$0xff] %v329_v23  }

// kernel: diffmamba_forward.5
= control target key start
LH: loop header
LB: loop body
LE: loop exit
PB: predicated region body
PF: predicated region fallthrough
CT: control target
= control target key end

     0   :  { %s2757_s1 = inlined_call_operand.vmem [shape: bf16[256,512], index: 1, kind: input, shape index: {}]   ;;  %s2758_s0 = inlined_call_operand.vmem [shape: bf16[16,256], index: 0, kind: input, shape index: {}]   ;;  %s2759_s3 = inlined_call_operand.vmem [shape: bf16[512,512], index: 3, kind: input, shape index: {}]   ;;  %s2760_s2 = inlined_call_operand.vmem [shape: f32[8,512], index: 2, kind: input, shape index: {}]   ;;  %s2761_s4 = inlined_call_operand.vmem [shape: f32[16,512], index: 4, kind: output, shape index: {}]  }
   0x1   :  { %v1751_v0 = vld [vmem:[%s2757_s1 + $0xe4] ss:$16 sps:$4 sm:$0xff]   ;;  %v1753_v1 = vld [vmem:[%s2757_s1 + $0xec] ss:$16 sps:$4 sm:$0xff]   ;;  %v1755_v2 = vld [vmem:[%s2757_s1 + $0xe0] ss:$16 sps:$4 sm:$0xff]  }
   0x2   :  { %435 = vmatprep.subr.bf16.mxu0 %v1751_v0  ;;  %v1756_v3 = vld [vmem:[%s2757_s1 + $0xe8] ss:$16 sps:$4 sm:$0xff]   ;;  %478 = vmatprep.subr.bf16.mxu1 %v1753_v1  ;;  %v1757_v4 = vld [vmem:[%s2757_s1 + $0xc4] ss:$16 sps:$4 sm:$0xff]   ;;  %v1759_v5 = vld [vmem:[%s2757_s1 + $0xcc] ss:$16 sps:$4 sm:$0xff]  }
   0x3   :  { %436 = vmatpush1.bf16.msra.mxu0 %v1755_v2  ;;  %479 = vmatpush1.bf16.msra.mxu1 %v1756_v3  ;;  %v1761_v6 = vld [vmem:[%s2757_s1 + $0xc0] ss:$16 sps:$4 sm:$0xff]   ;;  %v1762_v7 = vld [vmem:[%s2757_s1 + $0xc8] ss:$16 sps:$4 sm:$0xff]   ;;  %v1763_v8 = vld [vmem:[%s2757_s1 + $0xa4] ss:$16 sps:$4 sm:$0xff]  }
   0x4   :  { %437 = vmatprep.subr.bf16.mxu0 %v1757_v4  ;;  %480 = vmatprep.subr.bf16.mxu1 %v1759_v5  ;;  %v1765_v9 = vld [vmem:[%s2757_s1 + $0xac] ss:$16 sps:$4 sm:$0xff]   ;;  %v1767_v10 = vld [vmem:[%s2757_s1 + $0xa0] ss:$16 sps:$4 sm:$0xff]   ;;  %v1768_v11 = vld [vmem:[%s2757_s1 + $0xa8] ss:$16 sps:$4 sm:$0xff]  }
   0x5   :  { %v1769_v12 = vld [vmem:[%s2757_s1 + $0x84] ss:$16 sps:$4 sm:$0xff]   ;;  %v1771_v13 = vld [vmem:[%s2757_s1 + $0x8c] ss:$16 sps:$4 sm:$0xff]   ;;  %v1773_v14 = vld [vmem:[%s2757_s1 + $0x80] ss:$16 sps:$4 sm:$0xff]  }
   0x6   :  { %v1774_v15 = vld [vmem:[%s2757_s1 + $0x88] ss:$16 sps:$4 sm:$0xff]   ;;  %v1775_v16 = vld [vmem:[%s2757_s1 + $0x64] ss:$16 sps:$4 sm:$0xff]   ;;  %v1777_v17 = vld [vmem:[%s2757_s1 + $0x6c] ss:$16 sps:$4 sm:$0xff]  }
   0x7   :  { %438 = vmatpush1.bf16.msra.mxu0 %v1761_v6  ;;  %481 = vmatpush1.bf16.msra.mxu1 %v1762_v7  ;;  %v1779_v18 = vld [vmem:[%s2757_s1 + $0x60] ss:$16 sps:$4 sm:$0xff]   ;;  %v1780_v19 = vld [vmem:[%s2757_s1 + $0x68] ss:$16 sps:$4 sm:$0xff]   ;;  %v1781_v20 = vld [vmem:[%s2757_s1 + $0x44] ss:$16 sps:$4 sm:$0xff]  }
   0x8   :  { %439 = vmatprep.subr.bf16.mxu0 %v1763_v8  ;;  %482 = vmatprep.subr.bf16.mxu1 %v1765_v9  ;;  %v1783_v21 = vld [vmem:[%s2757_s1 + $0x4c] ss:$16 sps:$4 sm:$0xff]   ;;  %v1785_v22 = vld [vmem:[%s2757_s1 + $0x40] ss:$16 sps:$4 sm:$0xff]   ;;  %v1786_v23 = vld [vmem:[%s2757_s1 + $0x48] ss:$16 sps:$4 sm:$0xff]  }
   0x9   :  { %v1787_v24 = vld [vmem:[%s2757_s1 + $0x24] ss:$16 sps:$4 sm:$0xff]   ;;  %v1789_v25 = vld [vmem:[%s2757_s1 + $0x2c] ss:$16 sps:$4 sm:$0xff]   ;;  %v1791_v26 = vld [vmem:[%s2757_s1 + $0x20] ss:$16 sps:$4 sm:$0xff]  }
   0xa   :  { %v1792_v27 = vld [vmem:[%s2757_s1 + $0x28] ss:$16 sps:$4 sm:$0xff]   ;;  %v1793_v28 = vld [vmem:[%s2757_s1 + $0x4] ss:$16 sps:$4 sm:$0xff]   ;;  %v1795_v29 = vld [vmem:[%s2757_s1 + $0xc] ss:$16 sps:$4 sm:$0xff]  }
   0xb   :  { %440 = vmatpush1.bf16.msra.mxu0 %v1767_v10  ;;  %483 = vmatpush1.bf16.msra.mxu1 %v1768_v11  ;;  %v1797_v30 = vld [vmem:[%s2757_s1] ss:$16 sps:$4 sm:$0xff]   ;;  %v1798_v31 = vld [vmem:[%s2757_s1 + $0x8] ss:$16 sps:$4 sm:$0xff]   ;;  %v1799_v32 = vld [vmem:[%s2757_s1 + $0x1e4] ss:$16 sps:$4 sm:$0xff]  }
   0xc   :  { %441 = vmatprep.subr.bf16.mxu0 %v1769_v12  ;;  %484 = vmatprep.subr.bf16.mxu1 %v1771_v13  ;;  %v1801_v33 = vld [vmem:[%s2757_s1 + $0x1ec] ss:$16 sps:$4 sm:$0xff]   ;;  %v1803_v34 = vld [vmem:[%s2757_s1 + $0x1e0] ss:$16 sps:$4 sm:$0xff]   ;;  %v1804_v35 = vld [vmem:[%s2757_s1 + $0x1e8] ss:$16 sps:$4 sm:$0xff]  }
   0xd   :  { %v1805_v36 = vld [vmem:[%s2757_s1 + $0x1c4] ss:$16 sps:$4 sm:$0xff]   ;;  %v1807_v37 = vld [vmem:[%s2757_s1 + $0x1cc] ss:$16 sps:$4 sm:$0xff]   ;;  %v1809_v38 = vld [vmem:[%s2757_s1 + $0x1c0] ss:$16 sps:$4 sm:$0xff]  }
   0xe   :  { %v1810_v39 = vld [vmem:[%s2757_s1 + $0x1c8] ss:$16 sps:$4 sm:$0xff]   ;;  %v1811_v40 = vld [vmem:[%s2757_s1 + $0x1a4] ss:$16 sps:$4 sm:$0xff]   ;;  %v1813_v41 = vld [vmem:[%s2757_s1 + $0x1ac] ss:$16 sps:$4 sm:$0xff]  }
   0xf   :  { %442 = vmatpush1.bf16.msra.mxu0 %v1773_v14  ;;  %485 = vmatpush1.bf16.msra.mxu1 %v1774_v15  ;;  %v1815_v42 = vld [vmem:[%s2757_s1 + $0x1a0] ss:$16 sps:$4 sm:$0xff]   ;;  %v1816_v43 = vld [vmem:[%s2757_s1 + $0x1a8] ss:$16 sps:$4 sm:$0xff]   ;;  %v1817_v44 = vld [vmem:[%s2757_s1 + $0x184] ss:$16 sps:$4 sm:$0xff]  }
  0x10   :  { %443 = vmatprep.subr.bf16.mxu0 %v1775_v16  ;;  %486 = vmatprep.subr.bf16.mxu1 %v1777_v17  ;;  %v1819_v45 = vld [vmem:[%s2757_s1 + $0x18c] ss:$16 sps:$4 sm:$0xff]   ;;  %v1821_v46 = vld [vmem:[%s2757_s1 + $0x180] ss:$16 sps:$4 sm:$0xff]   ;;  %v1822_v47 = vld [vmem:[%s2757_s1 + $0x188] ss:$16 sps:$4 sm:$0xff]  }
  0x11   :  { %v1849_v48 = vld [vmem:[%s2758_s0 + $0x4] ss:$8 sps:$4 sm:$0xff]   ;;  %v1827_v51 = vld [vmem:[%s2757_s1 + $0x160] ss:$16 sps:$4 sm:$0xff]   ;;  %v1828_v52 = vld [vmem:[%s2757_s1 + $0x168] ss:$16 sps:$4 sm:$0xff]  }
  0x12   :  { %v1823_v49 = vld [vmem:[%s2757_s1 + $0x164] ss:$16 sps:$4 sm:$0xff]   ;;  %v1825_v50 = vld [vmem:[%s2757_s1 + $0x16c] ss:$16 sps:$4 sm:$0xff]   ;;  %467 = vmatprep.mubr.bf16.mxu0 %v1849_v48  ;;  %510 = vmatprep.mubr.bf16.mxu1 %v1849_v48  ;;  %v1833_v55 = vld [vmem:[%s2757_s1 + $0x140] ss:$16 sps:$4 sm:$0xff]  }
  0x13   :  { %444 = vmatpush1.bf16.msra.mxu0 %v1779_v18  ;;  %487 = vmatpush1.bf16.msra.mxu1 %v1780_v19  ;;  %v1829_v53 = vld [vmem:[%s2757_s1 + $0x144] ss:$16 sps:$4 sm:$0xff]   ;;  %v1831_v54 = vld [vmem:[%s2757_s1 + $0x14c] ss:$16 sps:$4 sm:$0xff]   ;;  %v1834_v56 = vld [vmem:[%s2757_s1 + $0x148] ss:$16 sps:$4 sm:$0xff]  }
  0x14   :  { %445 = vmatprep.subr.bf16.mxu0 %v1781_v20  ;;  %488 = vmatprep.subr.bf16.mxu1 %v1783_v21  ;;  %v1835_v57 = vld [vmem:[%s2757_s1 + $0x124] ss:$16 sps:$4 sm:$0xff]   ;;  %v1837_v58 = vld [vmem:[%s2757_s1 + $0x12c] ss:$16 sps:$4 sm:$0xff]   ;;  %v1839_v59 = vld [vmem:[%s2757_s1 + $0x120] ss:$16 sps:$4 sm:$0xff]  }
  0x15   :  { %v1840_v60 = vld [vmem:[%s2757_s1 + $0x128] ss:$16 sps:$4 sm:$0xff]   ;;  %v1841_v61 = vld [vmem:[%s2757_s1 + $0x104] ss:$16 sps:$4 sm:$0xff]   ;;  %v1843_v62 = vld [vmem:[%s2757_s1 + $0x10c] ss:$16 sps:$4 sm:$0xff]  }
  0x16   :  { %v1845_v63 = vld [vmem:[%s2757_s1 + $0x100] ss:$16 sps:$4 sm:$0xff]   ;;  %v1846_v0 = vld [vmem:[%s2757_s1 + $0x108] ss:$16 sps:$4 sm:$0xff]   ;;  %v1852_v1 = vld [vmem:[%s2759_s3 + $0xe4] ss:$16 sps:$4 sm:$0xff]  }
  0x17   :  { %446 = vmatpush1.bf16.msra.mxu0 %v1785_v22  ;;  %489 = vmatpush1.bf16.msra.mxu1 %v1786_v23  ;;  %v1855_v2 = vld [vmem:[%s2759_s3 + $0x2e4] ss:$16 sps:$4 sm:$0xff]   ;;  %v1847_v3 = vld [vmem:[%s2758_s0] ss:$8 sps:$4 sm:$0xff]  }
  0x18   :  { %447 = vmatprep.subr.bf16.mxu0 %v1787_v24  ;;  %490 = vmatprep.subr.bf16.mxu1 %v1789_v25  ;;  %v1850_v4 = vld [vmem:[%s2759_s3 + $0xe0] ss:$16 sps:$4 sm:$0xff]   ;;  %v1858_v6 = vld [vmem:[%s2759_s3 + $0xc4] ss:$16 sps:$4 sm:$0xff]  }
  0x19   :  { %v1853_v5 = vld [vmem:[%s2759_s3 + $0x2e0] ss:$16 sps:$4 sm:$0xff]   ;;  %v1861_v7 = vld [vmem:[%s2759_s3 + $0x2c4] ss:$16 sps:$4 sm:$0xff]  }
  0x1a   :  { %v1856_v8 = vld [vmem:[%s2759_s3 + $0xc0] ss:$16 sps:$4 sm:$0xff]   ;;  %v1864_v10 = vld [vmem:[%s2759_s3 + $0xa4] ss:$16 sps:$4 sm:$0xff]  }
  0x1b   :  { %448 = vmatpush1.bf16.msra.mxu0 %v1791_v26  ;;  %491 = vmatpush1.bf16.msra.mxu1 %v1792_v27  ;;  %v1859_v9 = vld [vmem:[%s2759_s3 + $0x2c0] ss:$16 sps:$4 sm:$0xff]   ;;  %v1867_v11 = vld [vmem:[%s2759_s3 + $0x2a4] ss:$16 sps:$4 sm:$0xff]  }
  0x1c   :  { %449 = vmatprep.subr.bf16.mxu0 %v1793_v28  ;;  %492 = vmatprep.subr.bf16.mxu1 %v1795_v29  ;;  %v1862_v12 = vld [vmem:[%s2759_s3 + $0xa0] ss:$16 sps:$4 sm:$0xff]   ;;  %v1870_v14 = vld [vmem:[%s2759_s3 + $0x84] ss:$16 sps:$4 sm:$0xff]  }
  0x1d   :  { %v1865_v13 = vld [vmem:[%s2759_s3 + $0x2a0] ss:$16 sps:$4 sm:$0xff]   ;;  %v1873_v15 = vld [vmem:[%s2759_s3 + $0x284] ss:$16 sps:$4 sm:$0xff]  }
  0x1e   :  { %v1868_v16 = vld [vmem:[%s2759_s3 + $0x80] ss:$16 sps:$4 sm:$0xff]   ;;  %v1876_v18 = vld [vmem:[%s2759_s3 + $0x64] ss:$16 sps:$4 sm:$0xff]  }
  0x1f   :  { %450 = vmatpush1.bf16.msra.mxu0 %v1797_v30  ;;  %493 = vmatpush1.bf16.msra.mxu1 %v1798_v31  ;;  %v1871_v17 = vld [vmem:[%s2759_s3 + $0x280] ss:$16 sps:$4 sm:$0xff]   ;;  %v1879_v19 = vld [vmem:[%s2759_s3 + $0x264] ss:$16 sps:$4 sm:$0xff]  }
  0x20   :  { %451 = vmatprep.subr.bf16.mxu0 %v1799_v32  ;;  %494 = vmatprep.subr.bf16.mxu1 %v1801_v33  ;;  %v1874_v20 = vld [vmem:[%s2759_s3 + $0x60] ss:$16 sps:$4 sm:$0xff]   ;;  %v1882_v22 = vld [vmem:[%s2759_s3 + $0x44] ss:$16 sps:$4 sm:$0xff]  }
  0x21   :  { %v1877_v21 = vld [vmem:[%s2759_s3 + $0x260] ss:$16 sps:$4 sm:$0xff]   ;;  %v1885_v23 = vld [vmem:[%s2759_s3 + $0x244] ss:$16 sps:$4 sm:$0xff]  }
  0x22   :  { %v1880_v24 = vld [vmem:[%s2759_s3 + $0x40] ss:$16 sps:$4 sm:$0xff]   ;;  %v1888_v26 = vld [vmem:[%s2759_s3 + $0x24] ss:$16 sps:$4 sm:$0xff]  }
  0x23   :  { %452 = vmatpush2.bf16.msra.mxu0 %v1803_v34  ;;  %495 = vmatpush2.bf16.msra.mxu1 %v1804_v35  ;;  %v1883_v25 = vld [vmem:[%s2759_s3 + $0x240] ss:$16 sps:$4 sm:$0xff]   ;;  %v1891_v27 = vld [vmem:[%s2759_s3 + $0x224] ss:$16 sps:$4 sm:$0xff]  }
  0x24   :  { %453 = vmatprep.subr.bf16.mxu0 %v1805_v36  ;;  %496 = vmatprep.subr.bf16.mxu1 %v1807_v37  ;;  %v1886_v28 = vld [vmem:[%s2759_s3 + $0x20] ss:$16 sps:$4 sm:$0xff]   ;;  %v1894_v30 = vld [vmem:[%s2759_s3 + $0x4] ss:$16 sps:$4 sm:$0xff]  }
  0x25   :  { %v1889_v29 = vld [vmem:[%s2759_s3 + $0x220] ss:$16 sps:$4 sm:$0xff]   ;;  %v1897_v31 = vld [vmem:[%s2759_s3 + $0x204] ss:$16 sps:$4 sm:$0xff]  }
  0x26   :  { %v1892_v32 = vld [vmem:[%s2759_s3] ss:$16 sps:$4 sm:$0xff]   ;;  %v1900_v34 = vld [vmem:[%s2759_s3 + $0x1e4] ss:$16 sps:$4 sm:$0xff]  }
  0x27   :  { %454 = vmatpush2.bf16.msra.mxu0 %v1809_v38  ;;  %497 = vmatpush2.bf16.msra.mxu1 %v1810_v39  ;;  %v1895_v33 = vld [vmem:[%s2759_s3 + $0x200] ss:$16 sps:$4 sm:$0xff]   ;;  %v1903_v35 = vld [vmem:[%s2759_s3 + $0x3e4] ss:$16 sps:$4 sm:$0xff]  }
  0x28   :  { %455 = vmatprep.subr.bf16.mxu0 %v1811_v40  ;;  %498 = vmatprep.subr.bf16.mxu1 %v1813_v41  ;;  %v1898_v36 = vld [vmem:[%s2759_s3 + $0x1e0] ss:$16 sps:$4 sm:$0xff]   ;;  %v1906_v38 = vld [vmem:[%s2759_s3 + $0x1c4] ss:$16 sps:$4 sm:$0xff]  }
  0x29   :  { %v1901_v37 = vld [vmem:[%s2759_s3 + $0x3e0] ss:$16 sps:$4 sm:$0xff]   ;;  %v1909_v39 = vld [vmem:[%s2759_s3 + $0x3c4] ss:$16 sps:$4 sm:$0xff]  }
  0x2a   :  { %v1904_v40 = vld [vmem:[%s2759_s3 + $0x1c0] ss:$16 sps:$4 sm:$0xff]  }
  0x2b   :  { %456 = vmatpush2.bf16.msra.mxu0 %v1815_v42  ;;  %499 = vmatpush2.bf16.msra.mxu1 %v1816_v43  ;;  %v1907_v41 = vld [vmem:[%s2759_s3 + $0x3c0] ss:$16 sps:$4 sm:$0xff]   ;;  %v1912_v42 = vld [vmem:[%s2759_s3 + $0x1a4] ss:$16 sps:$4 sm:$0xff]  }
  0x2c   :  { %457 = vmatprep.subr.bf16.mxu0 %v1817_v44  ;;  %500 = vmatprep.subr.bf16.mxu1 %v1819_v45  ;;  %v1915_v43 = vld [vmem:[%s2759_s3 + $0x3a4] ss:$16 sps:$4 sm:$0xff]   ;;  %v1910_v44 = vld [vmem:[%s2759_s3 + $0x1a0] ss:$16 sps:$4 sm:$0xff]  }
  0x2d   :  { %v1913_v45 = vld [vmem:[%s2759_s3 + $0x3a0] ss:$16 sps:$4 sm:$0xff]  }
  0x2e   :  { %v1916_v48 = vld [vmem:[%s2759_s3 + $0x180] ss:$16 sps:$4 sm:$0xff]  }
  0x2f   :  { %458 = vmatpush2.bf16.msra.mxu0 %v1821_v46  ;;  %501 = vmatpush2.bf16.msra.mxu1 %v1822_v47  ;;  %v1918_v46 = vld [vmem:[%s2759_s3 + $0x184] ss:$16 sps:$4 sm:$0xff]  }
  0x30   :  { %459 = vmatprep.subr.bf16.mxu0 %v1823_v49  ;;  %502 = vmatprep.subr.bf16.mxu1 %v1825_v50  ;;  %v1921_v47 = vld [vmem:[%s2759_s3 + $0x384] ss:$16 sps:$4 sm:$0xff]   ;;  %v1919_v49 = vld [vmem:[%s2759_s3 + $0x380] ss:$16 sps:$4 sm:$0xff]  }
  0x31   :  { %v1924_v50 = vld [vmem:[%s2759_s3 + $0x164] ss:$16 sps:$4 sm:$0xff]  }
  0x33   :  { %460 = vmatpush2.bf16.msra.mxu0 %v1827_v51  ;;  %503 = vmatpush2.bf16.msra.mxu1 %v1828_v52  ;;  %v1927_v51 = vld [vmem:[%s2759_s3 + $0x364] ss:$16 sps:$4 sm:$0xff]   ;;  %v1922_v52 = vld [vmem:[%s2759_s3 + $0x160] ss:$16 sps:$4 sm:$0xff]  }
  0x34   :  { %461 = vmatprep.subr.bf16.mxu0 %v1829_v53  ;;  %504 = vmatprep.subr.bf16.mxu1 %v1831_v54  ;;  %v1925_v53 = vld [vmem:[%s2759_s3 + $0x360] ss:$16 sps:$4 sm:$0xff]   ;;  %v1930_v54 = vld [vmem:[%s2759_s3 + $0x144] ss:$16 sps:$4 sm:$0xff]  }
  0x37   :  { %462 = vmatpush2.bf16.msra.mxu0 %v1833_v55  ;;  %505 = vmatpush2.bf16.msra.mxu1 %v1834_v56  ;;  %v1933_v55 = vld [vmem:[%s2759_s3 + $0x344] ss:$16 sps:$4 sm:$0xff]   ;;  %v1928_v56 = vld [vmem:[%s2759_s3 + $0x140] ss:$16 sps:$4 sm:$0xff]  }
  0x38   :  { %463 = vmatprep.subr.bf16.mxu0 %v1835_v57  ;;  %506 = vmatprep.subr.bf16.mxu1 %v1837_v58  ;;  %v1931_v57 = vld [vmem:[%s2759_s3 + $0x340] ss:$16 sps:$4 sm:$0xff]   ;;  %v1936_v58 = vld [vmem:[%s2759_s3 + $0x124] ss:$16 sps:$4 sm:$0xff]  }
  0x3b   :  { %464 = vmatpush2.bf16.msra.mxu0 %v1839_v59  ;;  %507 = vmatpush2.bf16.msra.mxu1 %v1840_v60  ;;  %v1939_v59 = vld [vmem:[%s2759_s3 + $0x324] ss:$16 sps:$4 sm:$0xff]   ;;  %v1934_v60 = vld [vmem:[%s2759_s3 + $0x120] ss:$16 sps:$4 sm:$0xff]  }
  0x3c   :  { %465 = vmatprep.subr.bf16.mxu0 %v1841_v61  ;;  %508 = vmatprep.subr.bf16.mxu1 %v1843_v62  ;;  %v1937_v61 = vld [vmem:[%s2759_s3 + $0x320] ss:$16 sps:$4 sm:$0xff]   ;;  %v1942_v62 = vld [vmem:[%s2759_s3 + $0x104] ss:$16 sps:$4 sm:$0xff]  }
  0x3f   :  { %466 = vmatpush2.bf16.msra.mxu0 %v1845_v63  ;;  %509 = vmatpush2.bf16.msra.mxu1 %v1846_v0  ;;  %v1945_v63 = vld [vmem:[%s2759_s3 + $0x304] ss:$16 sps:$4 sm:$0xff]   ;;  %v1940_v0 = vld [vmem:[%s2759_s3 + $0x100] ss:$16 sps:$4 sm:$0xff]  }
  0x40   :  { %1372 = vmatprep.subr.bf16.mxu0 %v1852_v1  ;;  %1415 = vmatprep.subr.bf16.mxu1 %v1855_v2  ;;  %v1943_v1 = vld [vmem:[%s2759_s3 + $0x300] ss:$16 sps:$4 sm:$0xff]   ;;  %v1948_v2 = vld [vmem:[%s2759_s3 + $0xec] ss:$16 sps:$4 sm:$0xff]  }
  0x42   :  { %468 = vmatmul.mubr.bf16.vlgmr.msra.gmra.mxu0 %v1847_v3  ;;  %511 = vmatmul.mubr.bf16.vlgmr.msra.gmra.mxu1 %v1847_v3  ;;  %v1951_v3 = vld [vmem:[%s2759_s3 + $0x2ec] ss:$16 sps:$4 sm:$0xff]  }
  0x43   :  { %1373 = vmatpush1.bf16.msra.mxu0 %v1850_v4  ;;  %1416 = vmatpush1.bf16.msra.mxu1 %v1853_v5  ;;  %v85_v4 = vlaneseq }
  0x44   :  { %1374 = vmatprep.subr.bf16.mxu0 %v1858_v6  ;;  %1417 = vmatprep.subr.bf16.mxu1 %v1861_v7 }
  0x45   :  { %v2495_v5 = vshrl.u32 %v85_v4, 7 }
  0x47   :  { %1375 = vmatpush1.bf16.msra.mxu0 %v1856_v8  ;;  %1418 = vmatpush1.bf16.msra.mxu1 %v1859_v9  ;;  %v87_v6 = vsub.s32 0, %v2495_v5  ;;  %v95_v7 = vsub.s32 2, %v2495_v5  ;;  %v83_v8 = vld [vmem:[%s2760_s2] ss:$8 sm:$0xf]  ;;  %v91_v9 = vsub.s32 1, %v2495_v5 }
  0x48   :  { %1376 = vmatprep.subr.bf16.mxu0 %v1864_v10  ;;  %1419 = vmatprep.subr.bf16.mxu1 %v1867_v11  ;;  %v99_v10 = vsub.s32 3, %v2495_v5 }
  0x49   :  { %v88_v11 = vrot.slane %v83_v8, %v87_v6 }
  0x4b   :  { %1377 = vmatpush1.bf16.msra.mxu0 %v1862_v12  ;;  %1420 = vmatpush1.bf16.msra.mxu1 %v1865_v13  ;;  %v96_v12 = vrot.slane %v83_v8, %v95_v7  ;;  %v92_v13 = vrot.slane %v83_v8, %v91_v9 }
  0x4c   :  { %1378 = vmatprep.subr.bf16.mxu0 %v1870_v14  ;;  %1421 = vmatprep.subr.bf16.mxu1 %v1873_v15  ;;  %v100_v14 = vrot.slane %v83_v8, %v99_v10 }
  0x4f   :  { %1379 = vmatpush1.bf16.msra.mxu0 %v1868_v16  ;;  %1422 = vmatpush1.bf16.msra.mxu1 %v1871_v17 }
  0x50   :  { %1380 = vmatprep.subr.bf16.mxu0 %v1876_v18  ;;  %1423 = vmatprep.subr.bf16.mxu1 %v1879_v19 }
  0x53   :  { %1381 = vmatpush1.bf16.msra.mxu0 %v1874_v20  ;;  %1424 = vmatpush1.bf16.msra.mxu1 %v1877_v21 }
  0x54   :  { %1382 = vmatprep.subr.bf16.mxu0 %v1882_v22  ;;  %1425 = vmatprep.subr.bf16.mxu1 %v1885_v23 }
  0x57   :  { %1383 = vmatpush1.bf16.msra.mxu0 %v1880_v24  ;;  %1426 = vmatpush1.bf16.msra.mxu1 %v1883_v25 }
  0x58   :  { %1384 = vmatprep.subr.bf16.mxu0 %v1888_v26  ;;  %1427 = vmatprep.subr.bf16.mxu1 %v1891_v27 }
  0x5b   :  { %1385 = vmatpush1.bf16.msra.mxu0 %v1886_v28  ;;  %1428 = vmatpush1.bf16.msra.mxu1 %v1889_v29 }
  0x5c   :  { %1386 = vmatprep.subr.bf16.mxu0 %v1894_v30  ;;  %1429 = vmatprep.subr.bf16.mxu1 %v1897_v31 }
  0x5f   :  { %1387 = vmatpush1.bf16.msra.mxu0 %v1892_v32  ;;  %1430 = vmatpush1.bf16.msra.mxu1 %v1895_v33 }
  0x60   :  { %1388 = vmatprep.subr.bf16.mxu0 %v1900_v34  ;;  %1431 = vmatprep.subr.bf16.mxu1 %v1903_v35 }
  0x63   :  { %1389 = vmatpush2.bf16.msra.mxu0 %v1898_v36  ;;  %1432 = vmatpush2.bf16.msra.mxu1 %v1901_v37 }
  0x64   :  { %1390 = vmatprep.subr.bf16.mxu0 %v1906_v38  ;;  %1433 = vmatprep.subr.bf16.mxu1 %v1909_v39 }
  0x67   :  { %1391 = vmatpush2.bf16.msra.mxu0 %v1904_v40  ;;  %1434 = vmatpush2.bf16.msra.mxu1 %v1907_v41 }
  0x68   :  { %1392 = vmatprep.subr.bf16.mxu0 %v1912_v42  ;;  %1435 = vmatprep.subr.bf16.mxu1 %v1915_v43 }
  0x6b   :  { %1393 = vmatpush2.bf16.msra.mxu0 %v1910_v44  ;;  %1436 = vmatpush2.bf16.msra.mxu1 %v1913_v45 }
  0x6c   :  { %1394 = vmatprep.subr.bf16.mxu0 %v1918_v46  ;;  %1437 = vmatprep.subr.bf16.mxu1 %v1921_v47 }
  0x6f   :  { %1395 = vmatpush2.bf16.msra.mxu0 %v1916_v48  ;;  %1438 = vmatpush2.bf16.msra.mxu1 %v1919_v49 }
  0x70   :  { %1396 = vmatprep.subr.bf16.mxu0 %v1924_v50  ;;  %1439 = vmatprep.subr.bf16.mxu1 %v1927_v51 }
  0x73   :  { %1397 = vmatpush2.bf16.msra.mxu0 %v1922_v52  ;;  %1440 = vmatpush2.bf16.msra.mxu1 %v1925_v53 }
  0x74   :  { %1398 = vmatprep.subr.bf16.mxu0 %v1930_v54  ;;  %1441 = vmatprep.subr.bf16.mxu1 %v1933_v55 }
  0x77   :  { %1399 = vmatpush2.bf16.msra.mxu0 %v1928_v56  ;;  %1442 = vmatpush2.bf16.msra.mxu1 %v1931_v57 }
  0x78   :  { %1400 = vmatprep.subr.bf16.mxu0 %v1936_v58  ;;  %1443 = vmatprep.subr.bf16.mxu1 %v1939_v59 }
  0x7b   :  { %1401 = vmatpush2.bf16.msra.mxu0 %v1934_v60  ;;  %1444 = vmatpush2.bf16.msra.mxu1 %v1937_v61 }
  0x7c   :  { %1402 = vmatprep.subr.bf16.mxu0 %v1942_v62  ;;  %1445 = vmatprep.subr.bf16.mxu1 %v1945_v63 }
  0x7f   :  { %1403 = vmatpush2.bf16.msra.mxu0 %v1940_v0  ;;  %1446 = vmatpush2.bf16.msra.mxu1 %v1943_v1 }
  0x80   :  { %1458 = vmatprep.subr.bf16.mxu0 %v1948_v2  ;;  %1501 = vmatprep.subr.bf16.mxu1 %v1951_v3 }
 0x102   :  { %v469_v15 = vpop.f32.mrf.mxu0  ;;  %v512_v16 = vpop.f32.mrf.mxu1 }
 0x103   :  { %v2512_v17 = vadd.f32 %v469_v15, %v88_v11  ;;  %v2514_v18 = vadd.f32 %v512_v16, %v96_v12 }
 0x104   :  { %v471_v19 = vpop.f32.mrf.mxu0  ;;  %v514_v20 = vpop.f32.mrf.mxu1 }
 0x105   :  { %v521_v21 = vsub.f32 0.0, %v2512_v17  ;;  %v523_v22 = vsub.f32 0.0, %v2514_v18  ;;  %v2518_v23 = vadd.f32 %v471_v19, %v92_v13  ;;  %v2520_v24 = vadd.f32 %v514_v20, %v100_v14 }
 0x106   :  { %v473_v25 = vpop.f32.mrf.mxu0  ;;  %v516_v26 = vpop.f32.mrf.mxu1 }
 0x107   :  { %v529_v27 = vmul.f32 1.442695, %v521_v21  ;;  %v533_v28 = vmul.f32 1.442695, %v523_v22  ;;  %v522_v29 = vsub.f32 0.0, %v2518_v23  ;;  %v524_v30 = vsub.f32 0.0, %v2520_v24 }
 0x108   :  { %v474_v31 = vadd.f32 %v473_v25, %v88_v11  ;;  %v517_v32 = vadd.f32 %v516_v26, %v96_v12  ;;  %v475_v33 = vpop.f32.mrf.mxu0  ;;  %v518_v34 = vpop.f32.mrf.mxu1  ;;  %v1946_v25 = vld [vmem:[%s2759_s3 + $0xe8] ss:$16 sps:$4 sm:$0xff]  }
 0x109   :  { %2042 = vpow2.f32 %v529_v27  ;;  %v531_v35 = vmul.f32 1.442695, %v522_v29  ;;  %v535_v36 = vmul.f32 1.442695, %v524_v30  ;;  %v476_v37 = vadd.f32 %v475_v33, %v92_v13  ;;  %v1955_v29 = vld [vmem:[%s2759_s3 + $0x2c8] ss:$16 sps:$4 sm:$0xff]  }
 0x10a   :  { %2044 = vpow2.f32 %v533_v28  ;;  %v525_v38 = vsub.f32 0.0, %v474_v31  ;;  %v527_v39 = vsub.f32 0.0, %v517_v32  ;;  %v519_v40 = vadd.f32 %v518_v34, %v100_v14  ;;  %v1960_v30 = vld [vmem:[%s2759_s3 + $0xac] ss:$16 sps:$4 sm:$0xff]   ;;  %v1961_v33 = vld [vmem:[%s2759_s3 + $0x2a8] ss:$16 sps:$4 sm:$0xff]  }
 0x10b   :  { %2046 = vpow2.f32 %v531_v35  ;;  %v526_v41 = vsub.f32 0.0, %v476_v37  ;;  %v1966_v34 = vld [vmem:[%s2759_s3 + $0x8c] ss:$16 sps:$4 sm:$0xff]  }
 0x10c   :  { %2048 = vpow2.f32 %v535_v36  ;;  %v537_v42 = vmul.f32 1.442695, %v525_v38  ;;  %v541_v43 = vmul.f32 1.442695, %v527_v39  ;;  %v528_v44 = vsub.f32 0.0, %v519_v40 }
 0x10d   :  { %v539_v45 = vmul.f32 1.442695, %v526_v41  ;;  %v1969_v35 = vld [vmem:[%s2759_s3 + $0x28c] ss:$16 sps:$4 sm:$0xff]   ;;  %v1964_v36 = vld [vmem:[%s2759_s3 + $0x88] ss:$16 sps:$4 sm:$0xff]  }
 0x10e   :  { %2050 = vpow2.f32 %v537_v42  ;;  %v543_v46 = vmul.f32 1.442695, %v528_v44  ;;  %v1972_v38 = vld [vmem:[%s2759_s3 + $0x6c] ss:$16 sps:$4 sm:$0xff]   ;;  %v1973_v41 = vld [vmem:[%s2759_s3 + $0x268] ss:$16 sps:$4 sm:$0xff]  }
 0x10f   :  { %2052 = vpow2.f32 %v541_v43  ;;  %v1975_v39 = vld [vmem:[%s2759_s3 + $0x26c] ss:$16 sps:$4 sm:$0xff]   ;;  %v1976_v44 = vld [vmem:[%s2759_s3 + $0x48] ss:$16 sps:$4 sm:$0xff]  }
 0x110   :  { %2054 = vpow2.f32 %v539_v45  ;;  %v1978_v42 = vld [vmem:[%s2759_s3 + $0x4c] ss:$16 sps:$4 sm:$0xff]   ;;  %v1979_v45 = vld [vmem:[%s2759_s3 + $0x248] ss:$16 sps:$4 sm:$0xff]  }
 0x111   :  { %2056 = vpow2.f32 %v543_v46  ;;  %v1981_v43 = vld [vmem:[%s2759_s3 + $0x24c] ss:$16 sps:$4 sm:$0xff]  }
 0x112   :  { %v1984_v46 = vld [vmem:[%s2759_s3 + $0x2c] ss:$16 sps:$4 sm:$0xff]  }
 0x116   :  { %v2043_v47 = vpop.eup %2042 }
 0x117   :  { %v2045_v48 = vpop.eup %2044  ;;  %v545_v49 = vadd.f32 1.0, %v2043_v47  ;;  %v1987_v47 = vld [vmem:[%s2759_s3 + $0x22c] ss:$16 sps:$4 sm:$0xff]  }
 0x118   :  { %v2047_v50 = vpop.eup %2046  ;;  %v547_v51 = vadd.f32 1.0, %v2045_v48  ;;  %v1982_v48 = vld [vmem:[%s2759_s3 + $0x28] ss:$16 sps:$4 sm:$0xff]  }
 0x119   :  { %v2049_v52 = vpop.eup %2048  ;;  %v546_v53 = vadd.f32 1.0, %v2047_v50  ;;  %2058 = vrcp.f32 %v545_v49  ;;  %v1985_v49 = vld [vmem:[%s2759_s3 + $0x228] ss:$16 sps:$4 sm:$0xff]   ;;  %v1990_v50 = vld [vmem:[%s2759_s3 + $0xc] ss:$16 sps:$4 sm:$0xff]  }
 0x11a   :  { %v548_v54 = vadd.f32 1.0, %v2049_v52  ;;  %2060 = vrcp.f32 %v547_v51  ;;  %v1993_v51 = vld [vmem:[%s2759_s3 + $0x20c] ss:$16 sps:$4 sm:$0xff]   ;;  %v1988_v52 = vld [vmem:[%s2759_s3 + $0x8] ss:$16 sps:$4 sm:$0xff]  }
 0x11b   :  { %v2051_v55 = vpop.eup %2050  ;;  %2062 = vrcp.f32 %v546_v53  ;;  %v1991_v53 = vld [vmem:[%s2759_s3 + $0x208] ss:$16 sps:$4 sm:$0xff]  }
 0x11c   :  { %v2053_v56 = vpop.eup %2052  ;;  %v549_v57 = vadd.f32 1.0, %v2051_v55  ;;  %2064 = vrcp.f32 %v548_v54  ;;  %v1996_v54 = vld [vmem:[%s2759_s3 + $0x1ec] ss:$16 sps:$4 sm:$0xff]  }
 0x11d   :  { %v2055_v58 = vpop.eup %2054  ;;  %v551_v59 = vadd.f32 1.0, %v2053_v56  ;;  %v1999_v55 = vld [vmem:[%s2759_s3 + $0x3ec] ss:$16 sps:$4 sm:$0xff]   ;;  %v1994_v56 = vld [vmem:[%s2759_s3 + $0x1e8] ss:$16 sps:$4 sm:$0xff]  }
 0x11e   :  { %v2057_v60 = vpop.eup %2056  ;;  %2066 = vrcp.f32 %v549_v57  ;;  %v550_v61 = vadd.f32 1.0, %v2055_v58  ;;  %v1997_v57 = vld [vmem:[%s2759_s3 + $0x3e8] ss:$16 sps:$4 sm:$0xff]   ;;  %v2002_v58 = vld [vmem:[%s2759_s3 + $0x1cc] ss:$16 sps:$4 sm:$0xff]  }
 0x11f   :  { %2068 = vrcp.f32 %v551_v59  ;;  %v552_v62 = vadd.f32 1.0, %v2057_v60  ;;  %v2005_v59 = vld [vmem:[%s2759_s3 + $0x3cc] ss:$16 sps:$4 sm:$0xff]   ;;  %v2000_v60 = vld [vmem:[%s2759_s3 + $0x1c8] ss:$16 sps:$4 sm:$0xff]  }
 0x120   :  { %2070 = vrcp.f32 %v550_v61  ;;  %v2003_v61 = vld [vmem:[%s2759_s3 + $0x3c8] ss:$16 sps:$4 sm:$0xff]  }
 0x121   :  { %2072 = vrcp.f32 %v552_v62  ;;  %v2008_v62 = vld [vmem:[%s2759_s3 + $0x1ac] ss:$16 sps:$4 sm:$0xff]  }
 0x126   :  { %v2059_v63 = vpop.eup %2058 }
 0x127   :  { %v2061_v0 = vpop.eup %2060  ;;  %v569_v16 = vmul.f32 %v2059_v63, %v2512_v17  ;;  %v1954_v17 = vld [vmem:[%s2759_s3 + $0xcc] ss:$16 sps:$4 sm:$0xff]  }
 0x128   :  { %v2063_v1 = vpop.eup %2062  ;;  %v571_v21 = vmul.f32 %v2061_v0, %v2514_v18  ;;  %v1957_v18 = vld [vmem:[%s2759_s3 + $0x2cc] ss:$16 sps:$4 sm:$0xff]   ;;  %v2006_v0 = vld [vmem:[%s2759_s3 + $0x1a8] ss:$16 sps:$4 sm:$0xff]  }
 0x129   :  { %v2065_v2 = vpop.eup %2064  ;;  %v570_v13 = vmul.f32 %v2063_v1, %v2518_v23  ;;  %v1949_v23 = vld [vmem:[%s2759_s3 + $0x2e8] ss:$16 sps:$4 sm:$0xff]   ;;  %v2011_v63 = vld [vmem:[%s2759_s3 + $0x3ac] ss:$16 sps:$4 sm:$0xff]  }
 0x12a   :  { %v572_v19 = vmul.f32 %v2065_v2, %v2520_v24  ;;  %v1952_v24 = vld [vmem:[%s2759_s3 + $0xc8] ss:$16 sps:$4 sm:$0xff]   ;;  %v2014_v2 = vld [vmem:[%s2759_s3 + $0x18c] ss:$16 sps:$4 sm:$0xff]  }
 0x12b   :  { %v2067_v3 = vpop.eup %2066  ;;  %v2009_v1 = vld [vmem:[%s2759_s3 + $0x3a8] ss:$16 sps:$4 sm:$0xff]  }
 0x12c   :  { %v2069_v4 = vpop.eup %2068  ;;  %v573_v11 = vmul.f32 %v2067_v3, %v474_v31  ;;  %v1963_v31 = vld [vmem:[%s2759_s3 + $0x2ac] ss:$16 sps:$4 sm:$0xff]  }
 0x12d   :  { %v2071_v8 = vpop.eup %2070  ;;  %v575_v14 = vmul.f32 %v2069_v4, %v517_v32  ;;  %v1958_v32 = vld [vmem:[%s2759_s3 + $0xa8] ss:$16 sps:$4 sm:$0xff]   ;;  %v2017_v3 = vld [vmem:[%s2759_s3 + $0x38c] ss:$16 sps:$4 sm:$0xff]  }
 0x12e   :  { %v2073_v12 = vpop.eup %2072  ;;  %v574_v15 = vmul.f32 %v2071_v8, %v476_v37  ;;  %v2531_v26 = vpack.c.bf16 %v573_v11, %v569_v16  ;;  %v1967_v37 = vld [vmem:[%s2759_s3 + $0x288] ss:$16 sps:$4 sm:$0xff]   ;;  %v2020_v11 = vld [vmem:[%s2759_s3 + $0x16c] ss:$16 sps:$4 sm:$0xff]  }
 0x12f   :  { %v576_v20 = vmul.f32 %v2073_v12, %v519_v40  ;;  %v2536_v28 = vpack.c.bf16 %v575_v14, %v571_v21  ;;  %v1970_v40 = vld [vmem:[%s2759_s3 + $0x68] ss:$16 sps:$4 sm:$0xff]   ;;  %v2023_v12 = vld [vmem:[%s2759_s3 + $0x36c] ss:$16 sps:$4 sm:$0xff]  }
 0x130   :  { %v578_v22 = vpack.c.bf16 %v574_v15, %v570_v13  ;;  %v2012_v4 = vld [vmem:[%s2759_s3 + $0x188] ss:$16 sps:$4 sm:$0xff]   ;;  %v2026_v15 = vld [vmem:[%s2759_s3 + $0x14c] ss:$16 sps:$4 sm:$0xff]  }
 0x131   :  { %v580_v27 = vpack.c.bf16 %v576_v20, %v572_v19  ;;  %v2015_v8 = vld [vmem:[%s2759_s3 + $0x388] ss:$16 sps:$4 sm:$0xff]   ;;  %v2029_v16 = vld [vmem:[%s2759_s3 + $0x34c] ss:$16 sps:$4 sm:$0xff]  }
 0x132   :  { %1404 = vmatprep.mubr.bf16.mxu0 %v578_v22  ;;  %v2018_v13 = vld [vmem:[%s2759_s3 + $0x168] ss:$16 sps:$4 sm:$0xff]   ;;  %v2032_v21 = vld [vmem:[%s2759_s3 + $0x12c] ss:$16 sps:$4 sm:$0xff]  }
 0x133   :  { %1447 = vmatprep.mubr.bf16.mxu1 %v580_v27  ;;  %1405 = vmatmul.mubr.bf16.vlgmr.msra.gmra.mxu0 %v2531_v26  ;;  %v2021_v14 = vld [vmem:[%s2759_s3 + $0x368] ss:$16 sps:$4 sm:$0xff]  }
 0x134   :  { %1448 = vmatmul.mubr.bf16.vlgmr.msra.gmra.mxu1 %v2536_v28  ;;  %1459 = vmatpush1.bf16.msra.mxu0 %v1946_v25  ;;  %v2024_v19 = vld [vmem:[%s2759_s3 + $0x148] ss:$16 sps:$4 sm:$0xff]  }
 0x135   :  { %1502 = vmatpush1.bf16.msra.mxu1 %v1949_v23  ;;  %1490 = vmatprep.mubr.bf16.mxu0 %v578_v22  ;;  %v2027_v20 = vld [vmem:[%s2759_s3 + $0x348] ss:$16 sps:$4 sm:$0xff]   ;;  %v2035_v22 = vld [vmem:[%s2759_s3 + $0x32c] ss:$16 sps:$4 sm:$0xff]  }
 0x136   :  { %1533 = vmatprep.mubr.bf16.mxu1 %v580_v27  ;;  %1460 = vmatprep.subr.bf16.mxu0 %v1954_v17  ;;  %v2030_v25 = vld [vmem:[%s2759_s3 + $0x128] ss:$16 sps:$4 sm:$0xff]   ;;  %v2038_v23 = vld [vmem:[%s2759_s3 + $0x10c] ss:$16 sps:$4 sm:$0xff]  }
 0x137   :  { %1503 = vmatprep.subr.bf16.mxu1 %v1957_v18  ;;  %v2033_v27 = vld [vmem:[%s2759_s3 + $0x328] ss:$16 sps:$4 sm:$0xff]   ;;  %v2041_v17 = vld [vmem:[%s2759_s3 + $0x30c] ss:$16 sps:$4 sm:$0xff]  }
 0x138   :  { %1461 = vmatpush1.bf16.msra.mxu0 %v1952_v24  ;;  %v2036_v18 = vld [vmem:[%s2759_s3 + $0x108] ss:$16 sps:$4 sm:$0xff]  }
 0x139   :  { %1504 = vmatpush1.bf16.msra.mxu1 %v1955_v29  ;;  %1462 = vmatprep.subr.bf16.mxu0 %v1960_v30  ;;  %v2039_v24 = vld [vmem:[%s2759_s3 + $0x308] ss:$16 sps:$4 sm:$0xff]  }
 0x13a   :  { %1505 = vmatprep.subr.bf16.mxu1 %v1963_v31  ;;  %v1622_v29 = vld [vmem:[%s2760_s2 + $0x1] ss:$8 sm:$0xf] }
 0x13b   :  { %v715_v30 = vrot.slane %v1622_v29, %v87_v6  ;;  %v719_v31 = vrot.slane %v1622_v29, %v91_v9 }
 0x13c   :  { %1463 = vmatpush1.bf16.msra.mxu0 %v1958_v32 }
 0x13d   :  { %1506 = vmatpush1.bf16.msra.mxu1 %v1961_v33  ;;  %1464 = vmatprep.subr.bf16.mxu0 %v1966_v34 }
 0x13e   :  { %1507 = vmatprep.subr.bf16.mxu1 %v1969_v35 }
 0x140   :  { %1465 = vmatpush1.bf16.msra.mxu0 %v1964_v36 }
 0x141   :  { %1508 = vmatpush1.bf16.msra.mxu1 %v1967_v37  ;;  %1466 = vmatprep.subr.bf16.mxu0 %v1972_v38 }
 0x142   :  { %1509 = vmatprep.subr.bf16.mxu1 %v1975_v39 }
 0x144   :  { %1467 = vmatpush1.bf16.msra.mxu0 %v1970_v40 }
 0x145   :  { %1510 = vmatpush1.bf16.msra.mxu1 %v1973_v41  ;;  %1468 = vmatprep.subr.bf16.mxu0 %v1978_v42 }
 0x146   :  { %1511 = vmatprep.subr.bf16.mxu1 %v1981_v43 }
 0x148   :  { %1469 = vmatpush1.bf16.msra.mxu0 %v1976_v44  ;;  %v723_v44 = vrot.slane %v1622_v29, %v95_v7 }
 0x149   :  { %1512 = vmatpush1.bf16.msra.mxu1 %v1979_v45  ;;  %1470 = vmatprep.subr.bf16.mxu0 %v1984_v46  ;;  %v727_v45 = vrot.slane %v1622_v29, %v99_v10 }
 0x14a   :  { %1513 = vmatprep.subr.bf16.mxu1 %v1987_v47 }
 0x14c   :  { %1471 = vmatpush1.bf16.msra.mxu0 %v1982_v48 }
 0x14d   :  { %1514 = vmatpush1.bf16.msra.mxu1 %v1985_v49  ;;  %1472 = vmatprep.subr.bf16.mxu0 %v1990_v50 }
 0x14e   :  { %1515 = vmatprep.subr.bf16.mxu1 %v1993_v51 }
 0x150   :  { %1473 = vmatpush1.bf16.msra.mxu0 %v1988_v52 }
 0x151   :  { %1516 = vmatpush1.bf16.msra.mxu1 %v1991_v53  ;;  %1474 = vmatprep.subr.bf16.mxu0 %v1996_v54 }
 0x152   :  { %1517 = vmatprep.subr.bf16.mxu1 %v1999_v55 }
 0x154   :  { %1475 = vmatpush2.bf16.msra.mxu0 %v1994_v56 }
 0x155   :  { %1518 = vmatpush2.bf16.msra.mxu1 %v1997_v57  ;;  %1476 = vmatprep.subr.bf16.mxu0 %v2002_v58 }
 0x156   :  { %1519 = vmatprep.subr.bf16.mxu1 %v2005_v59 }
 0x158   :  { %1477 = vmatpush2.bf16.msra.mxu0 %v2000_v60 }
 0x159   :  { %1520 = vmatpush2.bf16.msra.mxu1 %v2003_v61  ;;  %1478 = vmatprep.subr.bf16.mxu0 %v2008_v62 }
 0x15a   :  { %1521 = vmatprep.subr.bf16.mxu1 %v2011_v63 }
 0x15c   :  { %1479 = vmatpush2.bf16.msra.mxu0 %v2006_v0 }
 0x15d   :  { %1522 = vmatpush2.bf16.msra.mxu1 %v2009_v1  ;;  %1480 = vmatprep.subr.bf16.mxu0 %v2014_v2 }
 0x15e   :  { %1523 = vmatprep.subr.bf16.mxu1 %v2017_v3 }
 0x160   :  { %1481 = vmatpush2.bf16.msra.mxu0 %v2012_v4 }
 0x161   :  { %1524 = vmatpush2.bf16.msra.mxu1 %v2015_v8  ;;  %1482 = vmatprep.subr.bf16.mxu0 %v2020_v11 }
 0x162   :  { %1525 = vmatprep.subr.bf16.mxu1 %v2023_v12 }
 0x164   :  { %1483 = vmatpush2.bf16.msra.mxu0 %v2018_v13 }
 0x165   :  { %1526 = vmatpush2.bf16.msra.mxu1 %v2021_v14  ;;  %1484 = vmatprep.subr.bf16.mxu0 %v2026_v15 }
 0x166   :  { %1527 = vmatprep.subr.bf16.mxu1 %v2029_v16 }
 0x168   :  { %1485 = vmatpush2.bf16.msra.mxu0 %v2024_v19 }
 0x169   :  { %1528 = vmatpush2.bf16.msra.mxu1 %v2027_v20  ;;  %1486 = vmatprep.subr.bf16.mxu0 %v2032_v21 }
 0x16a   :  { %1529 = vmatprep.subr.bf16.mxu1 %v2035_v22 }
 0x16c   :  { %1487 = vmatpush2.bf16.msra.mxu0 %v2030_v25 }
 0x16d   :  { %1530 = vmatpush2.bf16.msra.mxu1 %v2033_v27  ;;  %1488 = vmatprep.subr.bf16.mxu0 %v2038_v23 }
 0x16e   :  { %1531 = vmatprep.subr.bf16.mxu1 %v2041_v17 }
 0x170   :  { %1489 = vmatpush2.bf16.msra.mxu0 %v2036_v18 }
 0x171   :  { %1532 = vmatpush2.bf16.msra.mxu1 %v2039_v24 }
 0x173   :  { %1491 = vmatmul.mubr.bf16.vlgmr.msra.gmra.mxu0 %v2531_v26 }
 0x174   :  { %1534 = vmatmul.mubr.bf16.vlgmr.msra.gmra.mxu1 %v2536_v28 }
 0x1f3   :  { %v1406_v32 = vpop.f32.mrf.mxu0 }
 0x1f4   :  { %v1407_v33 = vadd.f32 %v1406_v32, %v715_v30  ;;  %v1449_v34 = vpop.f32.mrf.mxu1 }
 0x1f5   :  { %v1408_v35 = vpop.f32.mrf.mxu0 }
 0x1f6   :  { %v1450_v36 = vadd.f32 %v1449_v34, %v1407_v33  ;;  %v1409_v37 = vadd.f32 %v1408_v35, %v719_v31  ;;  %v1451_v38 = vpop.f32.mrf.mxu1 }
 0x1f7   :  { %v1410_v26 = vpop.f32.mrf.mxu0 }
 0x1f8   :  { %1544 = vst [vmem:[%s2761_s4] sm:$0xff] %v1450_v36  ;;  %v1452_v28 = vadd.f32 %v1451_v38, %v1409_v37  ;;  %v1411_v39 = vadd.f32 %v1410_v26, %v715_v30  ;;  %v1453_v40 = vpop.f32.mrf.mxu1 }
 0x1f9   :  { %v1412_v41 = vpop.f32.mrf.mxu0 }
 0x1fa   :  { %1545 = vst [vmem:[%s2761_s4 + $0x8] sm:$0xff] %v1452_v28  ;;  %v1454_v6 = vadd.f32 %v1453_v40, %v1411_v39  ;;  %v1413_v9 = vadd.f32 %v1412_v41, %v719_v31  ;;  %v1455_v42 = vpop.f32.mrf.mxu1 }
 0x1fc   :  { %1548 = vst [vmem:[%s2761_s4 + $0x20] sm:$0xff] %v1454_v6  ;;  %v1456_v43 = vadd.f32 %v1455_v42, %v1413_v9 }
 0x1fe   :  { %1549 = vst [vmem:[%s2761_s4 + $0x28] sm:$0xff] %v1456_v43 }
 0x233   :  { %v1492_v46 = vpop.f32.mrf.mxu0 }
 0x234   :  { %v1493_v47 = vadd.f32 %v1492_v46, %v723_v44  ;;  %v1535_v48 = vpop.f32.mrf.mxu1 }
 0x235   :  { %v1494_v49 = vpop.f32.mrf.mxu0 }
 0x236   :  { %v1536_v50 = vadd.f32 %v1535_v48, %v1493_v47  ;;  %v1495_v51 = vadd.f32 %v1494_v49, %v727_v45  ;;  %v1537_v52 = vpop.f32.mrf.mxu1 }
 0x237   :  { %v1496_v53 = vpop.f32.mrf.mxu0 }
 0x238   :  { %1546 = vst [vmem:[%s2761_s4 + $0x10] sm:$0xff] %v1536_v50  ;;  %v1538_v54 = vadd.f32 %v1537_v52, %v1495_v51  ;;  %v1497_v55 = vadd.f32 %v1496_v53, %v723_v44  ;;  %v1539_v56 = vpop.f32.mrf.mxu1 }
 0x239   :  { %v1498_v57 = vpop.f32.mrf.mxu0 }
 0x23a   :  { %1547 = vst [vmem:[%s2761_s4 + $0x18] sm:$0xff] %v1538_v54  ;;  %v1540_v5 = vadd.f32 %v1539_v56, %v1497_v55  ;;  %v1499_v7 = vadd.f32 %v1498_v57, %v727_v45  ;;  %v1541_v10 = vpop.f32.mrf.mxu1 }
 0x23c   :  { %1550 = vst [vmem:[%s2761_s4 + $0x30] sm:$0xff] %v1540_v5  ;;  %v1542_v58 = vadd.f32 %v1541_v10, %v1499_v7 }
 0x23e   :  { %1551 = vst [vmem:[%s2761_s4 + $0x38] sm:$0xff] %v1542_v58 }

</bundles_post_ra>
